<compile_context>
chip_gen: v6e
topology: v6e:2x2x1
jax: 0.10.0
libtpu: 0.0.40
codegen_flags: <defaults>
</compile_context>

<pallas_src>
import jax
import jax.numpy as jnp
from jax.experimental import pallas as pl
from jax.experimental.pallas import tpu as pltpu

EPS = 1e-5


def _partition_blocks(block_num, max_parts=2):
    """Greedy 2-way balance of blocks by conv-layer count (block b has b+1 layers)."""
    order = sorted(range(block_num), key=lambda b: -(b + 1))
    parts = [[] for _ in range(max_parts)]
    loads = [0] * max_parts
    for b in order:
        g = loads.index(min(loads))
        parts[g].append(b)
        loads[g] += b + 1
    return [p for p in parts if p]


def make_feature_kernel(partitions, N, L, C, max_w):
    """Kernel: per grid point, run one partition's StackCNN blocks and write a
    lane-dense (N, max_w*C) pooled-feature slab."""

    def kernel(x_ref, *rest):
        out_ref = rest[-1]                               # (1, N, max_w*C)
        pid = pl.program_id(0)
        x = x_ref[...]                                   # (N, L, C) f32

        for g, part in enumerate(partitions):
            @pl.when(pid == g)
            def _run_partition(part=part):
                feats = []
                for bid in part:
                    w_ref, gam_ref, bet_ref = rest[3 * bid: 3 * bid + 3]
                    w = w_ref[...]                       # (nl, 3C, C) im2col layout
                    gam = gam_ref[...]                   # (nl, 1, C) BN gamma
                    bet = bet_ref[...]                   # (nl, 1, C) BN beta
                    h = x
                    l_cur = L
                    for li in range(bid + 1):
                        l_out = l_cur - 2
                        # im2col: 3 shifted slices on the lane axis, batch folded
                        # into M -> one (N*l_out, 3C) x (3C, C) MXU matmul.
                        # TODO(synk): optionally cast operands to bf16 on
                        # v6e/v7x once a tighter numerics check is in place.
                        patch = jnp.concatenate(
                            [h[:, k:k + l_out, :] for k in range(3)], axis=-1)
                        y = jnp.dot(patch.reshape(N * l_out, 3 * C), w[li],
                                    preferred_element_type=jnp.float32)
                        # One-pass training-mode (biased) BatchNorm stats.
                        cnt = float(N * l_out)
                        mean = jnp.sum(y, axis=0, keepdims=True) / cnt
                        var = jnp.sum(y * y, axis=0, keepdims=True) / cnt - mean * mean
                        inv = jax.lax.rsqrt(var + EPS)
                        scale = inv * gam[li]            # (1, C)
                        shift = bet[li] - mean * scale   # (1, C)
                        h = jnp.maximum(y * scale + shift, 0.0).reshape(N, l_out, C)
                        l_cur = l_out
                    # AdaptiveMaxPool1d(1).squeeze(-1): max over length.
                    feats.append(jnp.max(h, axis=1))     # (N, C)
                if len(part) < max_w:
                    feats.append(jnp.zeros((N, (max_w - len(part)) * C), jnp.float32))
                # Single lane-dense store of the whole pooled slab.
                out_ref[0] = jnp.concatenate(feats, axis=-1)

    return kernel


def linear_kernel(pooled_ref, w_ref, b_ref, out_ref):
    """Final Linear: sum of per-partition matmuls on the pooled slabs."""
    num_parts = pooled_ref.shape[0]
    acc = jnp.dot(pooled_ref[0], w_ref[0], preferred_element_type=jnp.float32)
    for g in range(1, num_parts):
        acc = acc + jnp.dot(pooled_ref[g], w_ref[g],
                            preferred_element_type=jnp.float32)
    out_ref[...] = acc + b_ref[...]


def drug_representation_forward(x_ids, params):
    # Embedding gather (padding_idx row is zero) -- glue, stays in plain JAX.
    emb = params["embedding"][x_ids].astype(jnp.float32)     # (N, L, C)
    N, L, C = emb.shape
    blocks = params["blocks"]
    block_num = len(blocks)

    partitions = _partition_blocks(block_num)
    num_parts = len(partitions)
    max_w = max(len(p) for p in partitions)
    slab_w = max_w * C

    # Per-block params in original block order; conv weights reshaped to the
    # im2col (nl, 3*C, C) layout.  Conv bias is NOT passed: it cancels exactly
    # under training-mode (batch-stat) BatchNorm.
    args = [emb]
    for bp in blocks:
        nl = bp["w"].shape[0]
        args += [bp["w"].reshape(nl, 3 * C, C), bp["g"], bp["b"]]

    def full_spec(a):
        return pl.BlockSpec(a.shape, lambda i, _nd=a.ndim: (0,) * _nd)

    feat_kernel = make_feature_kernel(partitions, N, L, C, max_w)
    pooled = pl.pallas_call(
        feat_kernel,
        out_shape=jax.ShapeDtypeStruct((num_parts, N, slab_w), jnp.float32),
        grid=(num_parts,),
        in_specs=[full_spec(a) for a in args],
        out_specs=pl.BlockSpec((1, N, slab_w), lambda i: (i, 0, 0)),
        compiler_params=pltpu.CompilerParams(
            dimension_semantics=("parallel",),            # both TCs on v7x
            vmem_limit_bytes=32 * 1024 * 1024),
    )(*args)
    # TODO(synk): for production N/L (e.g. N>=256, L~100, C=128) tile over N
    # with a two-pass BatchNorm (stats pass + normalize pass) to stay inside
    # v7x's 64 MiB VMEM instead of keeping all activations resident.

    # Fold the block-feature concat ordering into the linear weight so the
    # final matmul consumes the partitioned pooled slabs directly.
    lin_w = params["lin_w"]
    lin_w_eff = jnp.zeros((num_parts, slab_w, C), jnp.float32)
    for g, part in enumerate(partitions):
        for j, bid in enumerate(part):
            lin_w_eff = lin_w_eff.at[g, j * C:(j + 1) * C, :].set(
                lin_w[bid * C:(bid + 1) * C, :])

    lin_args = [pooled, lin_w_eff, params["lin_b"]]
    return pl.pallas_call(
        linear_kernel,
        out_shape=jax.ShapeDtypeStruct((N, C), jnp.float32),
        grid=(1,),
        in_specs=[full_spec(a) for a in lin_args],
        out_specs=pl.BlockSpec((N, C), lambda i: (0, 0)),
        compiler_params=pltpu.CompilerParams(dimension_semantics=("arbitrary",)),
    )(*lin_args)


def reference_forward(x_ids, params):
    """Pure-JAX reference mirroring the PyTorch module (training-mode BN,
    conv bias included)."""
    emb = params["embedding"][x_ids].astype(jnp.float32)
    N, L, C = emb.shape
    feats = []
    for bp in params["blocks"]:
        w, cb, g, b = bp["w"], bp["cb"], bp["g"], bp["b"]
        h = emb
        for li in range(w.shape[0]):
            l_out = h.shape[1] - 2
            acc = jnp.zeros((N, l_out, C), jnp.float32)
            for k in range(3):
                acc = acc + jnp.einsum("nlc,cd->nld", h[:, k:k + l_out, :],
                                       w[li, k],
                                       precision=jax.lax.Precision.HIGHEST)
            y = acc + cb[li][None]
            mean = jnp.mean(y, axis=(0, 1), keepdims=True)
            var = jnp.mean((y - mean) ** 2, axis=(0, 1), keepdims=True)
            y = (y - mean) / jnp.sqrt(var + EPS) * g[li][None] + b[li][None]
            h = jnp.maximum(y, 0.0)
        feats.append(jnp.max(h, axis=1))
    x_cat = jnp.concatenate(feats, axis=-1)
    return jnp.dot(x_cat, params["lin_w"],
                   precision=jax.lax.Precision.HIGHEST) + params["lin_b"]


def init_params(key, block_num, vocab_size, embedding_num):
    C = embedding_num
    keys = jax.random.split(key, 3 + block_num)
    emb = 0.5 * jax.random.normal(keys[0], (vocab_size, C), jnp.float32)
    emb = emb.at[0].set(0.0)                       # nn.Embedding padding_idx=0
    blocks = []
    for bi in range(block_num):
        nl = bi + 1                                # StackCNN(block_idx+1, ...)
        kk = jax.random.split(keys[1 + bi], 4)
        # Conv weight stored as (nl, K=3, C_in, C_out)  (PyTorch (out,in,K) transposed)
        w = jax.random.normal(kk[0], (nl, 3, C, C), jnp.float32) / jnp.sqrt(3.0 * C)
        cb = 0.05 * jax.random.normal(kk[1], (nl, 1, C), jnp.float32)      # conv bias
        g = 1.0 + 0.1 * jax.random.normal(kk[2], (nl, 1, C), jnp.float32)  # BN gamma
        b = 0.1 * jax.random.normal(kk[3], (nl, 1, C), jnp.float32)        # BN beta
        blocks.append(dict(w=w, cb=cb, g=g, b=b))
    lin_w = jax.random.normal(keys[1 + block_num], (block_num * C, C),
                              jnp.float32) / jnp.sqrt(float(block_num * C))
    lin_b = 0.05 * jax.random.normal(keys[2 + block_num], (1, C), jnp.float32)
    return dict(embedding=emb, blocks=blocks, lin_w=lin_w, lin_b=lin_b)


if __name__ == "__main__":
    block_num, vocab_size, embedding_num = 3, 24, 32
    N, L = 2, 16

    key = jax.random.PRNGKey(0)
    pkey, xkey = jax.random.split(key)
    params = init_params(pkey, block_num, vocab_size, embedding_num)
    x_ids = jax.random.randint(xkey, (N, L), 0, vocab_size, dtype=jnp.int32)

    out = drug_representation_forward(x_ids, params)
    out = jax.block_until_ready(out)

    ref = reference_forward(x_ids, params)
    assert out.shape == (N, embedding_num), out.shape
    assert bool(jnp.allclose(out, ref, atol=5e-3, rtol=5e-3)), (
        "mismatch vs pure-JAX reference")

    print("KERNEL_OK")
</pallas_src>

<mosaic_0001>
module attributes {stable_mosaic.version = 11 : i64} {
  func.func @kernel(%arg0: i32, %arg1: memref<2x16x32xf32, #tpu.memory_space<vmem>>, %arg2: memref<1x96x32xf32, #tpu.memory_space<vmem>>, %arg3: memref<1x1x32xf32, #tpu.memory_space<vmem>>, %arg4: memref<1x1x32xf32, #tpu.memory_space<vmem>>, %arg5: memref<2x96x32xf32, #tpu.memory_space<vmem>>, %arg6: memref<2x1x32xf32, #tpu.memory_space<vmem>>, %arg7: memref<2x1x32xf32, #tpu.memory_space<vmem>>, %arg8: memref<3x96x32xf32, #tpu.memory_space<vmem>>, %arg9: memref<3x1x32xf32, #tpu.memory_space<vmem>>, %arg10: memref<3x1x32xf32, #tpu.memory_space<vmem>>, %arg11: memref<1x2x64xf32, #tpu.memory_space<vmem>>) attributes {dimension_semantics = [#tpu.dimension_semantics<parallel>], iteration_bounds = array<i64: 2>, scalar_prefetch = 0 : i64, scratch_operands = 0 : i64, tpu.core_type = #tpu.core_type<tc>, window_params = [{pipeline_mode = #tpu.pipeline_mode<synchronous>, transform_indices = @transform_0, window_bounds = array<i64: 2, 16, 32>}, {pipeline_mode = #tpu.pipeline_mode<synchronous>, transform_indices = @transform_1, window_bounds = array<i64: 1, 96, 32>}, {pipeline_mode = #tpu.pipeline_mode<synchronous>, transform_indices = @transform_2, window_bounds = array<i64: 1, 1, 32>}, {pipeline_mode = #tpu.pipeline_mode<synchronous>, transform_indices = @transform_3, window_bounds = array<i64: 1, 1, 32>}, {pipeline_mode = #tpu.pipeline_mode<synchronous>, transform_indices = @transform_4, window_bounds = array<i64: 2, 96, 32>}, {pipeline_mode = #tpu.pipeline_mode<synchronous>, transform_indices = @transform_5, window_bounds = array<i64: 2, 1, 32>}, {pipeline_mode = #tpu.pipeline_mode<synchronous>, transform_indices = @transform_6, window_bounds = array<i64: 2, 1, 32>}, {pipeline_mode = #tpu.pipeline_mode<synchronous>, transform_indices = @transform_7, window_bounds = array<i64: 3, 96, 32>}, {pipeline_mode = #tpu.pipeline_mode<synchronous>, transform_indices = @transform_8, window_bounds = array<i64: 3, 1, 32>}, {pipeline_mode = #tpu.pipeline_mode<synchronous>, transform_indices = @transform_9, window_bounds = array<i64: 3, 1, 32>}, {transform_indices = @transform_10, window_bounds = array<i64: 1, 2, 64>}]} {
    %c0 = arith.constant 0 : index
    %c0_0 = arith.constant 0 : index
    %c0_1 = arith.constant 0 : index
    %0 = vector.load %arg1[%c0, %c0_0, %c0_1] : memref<2x16x32xf32, #tpu.memory_space<vmem>>, vector<2x16x32xf32>
    %c0_i32 = arith.constant 0 : i32
    %1 = arith.cmpi eq, %arg0, %c0_i32 : i32
    %2 = arith.extui %1 : i1 to i32
    %c0_i32_2 = arith.constant 0 : i32
    %3 = arith.cmpi ne, %2, %c0_i32_2 : i32
    scf.if %3 {
      %c0_4 = arith.constant 0 : index
      %c0_5 = arith.constant 0 : index
      %c0_6 = arith.constant 0 : index
      %7 = vector.load %arg8[%c0_4, %c0_5, %c0_6] : memref<3x96x32xf32, #tpu.memory_space<vmem>>, vector<3x96x32xf32>
      %c0_7 = arith.constant 0 : index
      %c0_8 = arith.constant 0 : index
      %c0_9 = arith.constant 0 : index
      %8 = vector.load %arg9[%c0_7, %c0_8, %c0_9] : memref<3x1x32xf32, #tpu.memory_space<vmem>>, vector<3x1x32xf32>
      %c0_10 = arith.constant 0 : index
      %c0_11 = arith.constant 0 : index
      %c0_12 = arith.constant 0 : index
      %9 = vector.load %arg10[%c0_10, %c0_11, %c0_12] : memref<3x1x32xf32, #tpu.memory_space<vmem>>, vector<3x1x32xf32>
      %10 = vector.extract_strided_slice %0 {offsets = [0, 0, 0], sizes = [2, 14, 32], strides = [1, 1, 1]} : vector<2x16x32xf32> to vector<2x14x32xf32>
      %11 = vector.extract_strided_slice %0 {offsets = [0, 1, 0], sizes = [2, 14, 32], strides = [1, 1, 1]} : vector<2x16x32xf32> to vector<2x14x32xf32>
      %12 = vector.extract_strided_slice %0 {offsets = [0, 2, 0], sizes = [2, 14, 32], strides = [1, 1, 1]} : vector<2x16x32xf32> to vector<2x14x32xf32>
      %13 = tpu.concatenate %10, %11, %12 in 2 : vector<2x14x32xf32>, vector<2x14x32xf32>, vector<2x14x32xf32> -> vector<2x14x96xf32>
      %14 = vector.shape_cast %13 : vector<2x14x96xf32> to vector<28x96xf32>
      %15 = vector.extract_strided_slice %7 {offsets = [0, 0, 0], sizes = [1, 96, 32], strides = [1, 1, 1]} : vector<3x96x32xf32> to vector<1x96x32xf32>
      %16 = vector.shape_cast %15 : vector<1x96x32xf32> to vector<96x32xf32>
      %cst = arith.constant dense<0.000000e+00> : vector<28x32xf32>
      %17 = tpu.matmul %14, %16, %cst {dimension_numbers = #tpu.dot_dimension_numbers<[1], [0], [0], [1], [0, 0, 1, 1], [], []>} : vector<28x96xf32>, vector<96x32xf32>, vector<28x32xf32> -> vector<28x32xf32>
      %cst_13 = arith.constant dense<0.000000e+00> : vector<32xf32>
      %18 = vector.multi_reduction <add>, %17, %cst_13 [0] : vector<28x32xf32> to vector<32xf32>
      %19 = vector.shape_cast %18 : vector<32xf32> to vector<1x32xf32>
      %cst_14 = arith.constant 2.800000e+01 : f32
      %20 = vector.broadcast %cst_14 : f32 to vector<1x32xf32>
      %21 = arith.divf %19, %20 : vector<1x32xf32>
      %22 = arith.mulf %17, %17 : vector<28x32xf32>
      %cst_15 = arith.constant dense<0.000000e+00> : vector<32xf32>
      %23 = vector.multi_reduction <add>, %22, %cst_15 [0] : vector<28x32xf32> to vector<32xf32>
      %24 = vector.shape_cast %23 : vector<32xf32> to vector<1x32xf32>
      %cst_16 = arith.constant 2.800000e+01 : f32
      %25 = vector.broadcast %cst_16 : f32 to vector<1x32xf32>
      %26 = arith.divf %24, %25 : vector<1x32xf32>
      %27 = arith.mulf %21, %21 : vector<1x32xf32>
      %28 = arith.subf %26, %27 : vector<1x32xf32>
      %cst_17 = arith.constant 9.99999974E-6 : f32
      %29 = vector.broadcast %cst_17 : f32 to vector<1x32xf32>
      %30 = arith.addf %28, %29 : vector<1x32xf32>
      %31 = math.rsqrt %30 : vector<1x32xf32>
      %32 = vector.extract_strided_slice %8 {offsets = [0, 0, 0], sizes = [1, 1, 32], strides = [1, 1, 1]} : vector<3x1x32xf32> to vector<1x1x32xf32>
      %33 = vector.shape_cast %32 : vector<1x1x32xf32> to vector<1x32xf32>
      %34 = arith.mulf %31, %33 : vector<1x32xf32>
      %35 = vector.extract_strided_slice %9 {offsets = [0, 0, 0], sizes = [1, 1, 32], strides = [1, 1, 1]} : vector<3x1x32xf32> to vector<1x1x32xf32>
      %36 = vector.shape_cast %35 : vector<1x1x32xf32> to vector<1x32xf32>
      %37 = arith.mulf %21, %34 : vector<1x32xf32>
      %38 = arith.subf %36, %37 : vector<1x32xf32>
      %39 = vector.broadcast %34 : vector<1x32xf32> to vector<28x32xf32>
      %40 = arith.mulf %17, %39 : vector<28x32xf32>
      %41 = vector.broadcast %38 : vector<1x32xf32> to vector<28x32xf32>
      %42 = arith.addf %40, %41 : vector<28x32xf32>
      %cst_18 = arith.constant 0.000000e+00 : f32
      %43 = vector.broadcast %cst_18 : f32 to vector<28x32xf32>
      %44 = arith.maximumf %42, %43 : vector<28x32xf32>
      %45 = vector.shape_cast %44 : vector<28x32xf32> to vector<2x14x32xf32>
      %46 = vector.extract_strided_slice %45 {offsets = [0, 0, 0], sizes = [2, 12, 32], strides = [1, 1, 1]} : vector<2x14x32xf32> to vector<2x12x32xf32>
      %47 = vector.extract_strided_slice %45 {offsets = [0, 1, 0], sizes = [2, 12, 32], strides = [1, 1, 1]} : vector<2x14x32xf32> to vector<2x12x32xf32>
      %48 = vector.extract_strided_slice %45 {offsets = [0, 2, 0], sizes = [2, 12, 32], strides = [1, 1, 1]} : vector<2x14x32xf32> to vector<2x12x32xf32>
      %49 = tpu.concatenate %46, %47, %48 in 2 : vector<2x12x32xf32>, vector<2x12x32xf32>, vector<2x12x32xf32> -> vector<2x12x96xf32>
      %50 = vector.shape_cast %49 : vector<2x12x96xf32> to vector<24x96xf32>
      %51 = vector.extract_strided_slice %7 {offsets = [1, 0, 0], sizes = [1, 96, 32], strides = [1, 1, 1]} : vector<3x96x32xf32> to vector<1x96x32xf32>
      %52 = vector.shape_cast %51 : vector<1x96x32xf32> to vector<96x32xf32>
      %cst_19 = arith.constant dense<0.000000e+00> : vector<24x32xf32>
      %53 = tpu.matmul %50, %52, %cst_19 {dimension_numbers = #tpu.dot_dimension_numbers<[1], [0], [0], [1], [0, 0, 1, 1], [], []>} : vector<24x96xf32>, vector<96x32xf32>, vector<24x32xf32> -> vector<24x32xf32>
      %cst_20 = arith.constant dense<0.000000e+00> : vector<32xf32>
      %54 = vector.multi_reduction <add>, %53, %cst_20 [0] : vector<24x32xf32> to vector<32xf32>
      %55 = vector.shape_cast %54 : vector<32xf32> to vector<1x32xf32>
      %cst_21 = arith.constant 2.400000e+01 : f32
      %56 = vector.broadcast %cst_21 : f32 to vector<1x32xf32>
      %57 = arith.divf %55, %56 : vector<1x32xf32>
      %58 = arith.mulf %53, %53 : vector<24x32xf32>
      %cst_22 = arith.constant dense<0.000000e+00> : vector<32xf32>
      %59 = vector.multi_reduction <add>, %58, %cst_22 [0] : vector<24x32xf32> to vector<32xf32>
      %60 = vector.shape_cast %59 : vector<32xf32> to vector<1x32xf32>
      %cst_23 = arith.constant 2.400000e+01 : f32
      %61 = vector.broadcast %cst_23 : f32 to vector<1x32xf32>
      %62 = arith.divf %60, %61 : vector<1x32xf32>
      %63 = arith.mulf %57, %57 : vector<1x32xf32>
      %64 = arith.subf %62, %63 : vector<1x32xf32>
      %cst_24 = arith.constant 9.99999974E-6 : f32
      %65 = vector.broadcast %cst_24 : f32 to vector<1x32xf32>
      %66 = arith.addf %64, %65 : vector<1x32xf32>
      %67 = math.rsqrt %66 : vector<1x32xf32>
      %68 = vector.extract_strided_slice %8 {offsets = [1, 0, 0], sizes = [1, 1, 32], strides = [1, 1, 1]} : vector<3x1x32xf32> to vector<1x1x32xf32>
      %69 = vector.shape_cast %68 : vector<1x1x32xf32> to vector<1x32xf32>
      %70 = arith.mulf %67, %69 : vector<1x32xf32>
      %71 = vector.extract_strided_slice %9 {offsets = [1, 0, 0], sizes = [1, 1, 32], strides = [1, 1, 1]} : vector<3x1x32xf32> to vector<1x1x32xf32>
      %72 = vector.shape_cast %71 : vector<1x1x32xf32> to vector<1x32xf32>
      %73 = arith.mulf %57, %70 : vector<1x32xf32>
      %74 = arith.subf %72, %73 : vector<1x32xf32>
      %75 = vector.broadcast %70 : vector<1x32xf32> to vector<24x32xf32>
      %76 = arith.mulf %53, %75 : vector<24x32xf32>
      %77 = vector.broadcast %74 : vector<1x32xf32> to vector<24x32xf32>
      %78 = arith.addf %76, %77 : vector<24x32xf32>
      %cst_25 = arith.constant 0.000000e+00 : f32
      %79 = vector.broadcast %cst_25 : f32 to vector<24x32xf32>
      %80 = arith.maximumf %78, %79 : vector<24x32xf32>
      %81 = vector.shape_cast %80 : vector<24x32xf32> to vector<2x12x32xf32>
      %82 = vector.extract_strided_slice %81 {offsets = [0, 0, 0], sizes = [2, 10, 32], strides = [1, 1, 1]} : vector<2x12x32xf32> to vector<2x10x32xf32>
      %83 = vector.extract_strided_slice %81 {offsets = [0, 1, 0], sizes = [2, 10, 32], strides = [1, 1, 1]} : vector<2x12x32xf32> to vector<2x10x32xf32>
      %84 = vector.extract_strided_slice %81 {offsets = [0, 2, 0], sizes = [2, 10, 32], strides = [1, 1, 1]} : vector<2x12x32xf32> to vector<2x10x32xf32>
      %85 = tpu.concatenate %82, %83, %84 in 2 : vector<2x10x32xf32>, vector<2x10x32xf32>, vector<2x10x32xf32> -> vector<2x10x96xf32>
      %86 = vector.shape_cast %85 : vector<2x10x96xf32> to vector<20x96xf32>
      %87 = vector.extract_strided_slice %7 {offsets = [2, 0, 0], sizes = [1, 96, 32], strides = [1, 1, 1]} : vector<3x96x32xf32> to vector<1x96x32xf32>
      %88 = vector.shape_cast %87 : vector<1x96x32xf32> to vector<96x32xf32>
      %cst_26 = arith.constant dense<0.000000e+00> : vector<20x32xf32>
      %89 = tpu.matmul %86, %88, %cst_26 {dimension_numbers = #tpu.dot_dimension_numbers<[1], [0], [0], [1], [0, 0, 1, 1], [], []>} : vector<20x96xf32>, vector<96x32xf32>, vector<20x32xf32> -> vector<20x32xf32>
      %cst_27 = arith.constant dense<0.000000e+00> : vector<32xf32>
      %90 = vector.multi_reduction <add>, %89, %cst_27 [0] : vector<20x32xf32> to vector<32xf32>
      %91 = vector.shape_cast %90 : vector<32xf32> to vector<1x32xf32>
      %cst_28 = arith.constant 2.000000e+01 : f32
      %92 = vector.broadcast %cst_28 : f32 to vector<1x32xf32>
      %93 = arith.divf %91, %92 : vector<1x32xf32>
      %94 = arith.mulf %89, %89 : vector<20x32xf32>
      %cst_29 = arith.constant dense<0.000000e+00> : vector<32xf32>
      %95 = vector.multi_reduction <add>, %94, %cst_29 [0] : vector<20x32xf32> to vector<32xf32>
      %96 = vector.shape_cast %95 : vector<32xf32> to vector<1x32xf32>
      %cst_30 = arith.constant 2.000000e+01 : f32
      %97 = vector.broadcast %cst_30 : f32 to vector<1x32xf32>
      %98 = arith.divf %96, %97 : vector<1x32xf32>
      %99 = arith.mulf %93, %93 : vector<1x32xf32>
      %100 = arith.subf %98, %99 : vector<1x32xf32>
      %cst_31 = arith.constant 9.99999974E-6 : f32
      %101 = vector.broadcast %cst_31 : f32 to vector<1x32xf32>
      %102 = arith.addf %100, %101 : vector<1x32xf32>
      %103 = math.rsqrt %102 : vector<1x32xf32>
      %104 = vector.extract_strided_slice %8 {offsets = [2, 0, 0], sizes = [1, 1, 32], strides = [1, 1, 1]} : vector<3x1x32xf32> to vector<1x1x32xf32>
      %105 = vector.shape_cast %104 : vector<1x1x32xf32> to vector<1x32xf32>
      %106 = arith.mulf %103, %105 : vector<1x32xf32>
      %107 = vector.extract_strided_slice %9 {offsets = [2, 0, 0], sizes = [1, 1, 32], strides = [1, 1, 1]} : vector<3x1x32xf32> to vector<1x1x32xf32>
      %108 = vector.shape_cast %107 : vector<1x1x32xf32> to vector<1x32xf32>
      %109 = arith.mulf %93, %106 : vector<1x32xf32>
      %110 = arith.subf %108, %109 : vector<1x32xf32>
      %111 = vector.broadcast %106 : vector<1x32xf32> to vector<20x32xf32>
      %112 = arith.mulf %89, %111 : vector<20x32xf32>
      %113 = vector.broadcast %110 : vector<1x32xf32> to vector<20x32xf32>
      %114 = arith.addf %112, %113 : vector<20x32xf32>
      %cst_32 = arith.constant 0.000000e+00 : f32
      %115 = vector.broadcast %cst_32 : f32 to vector<20x32xf32>
      %116 = arith.maximumf %114, %115 : vector<20x32xf32>
      %117 = vector.shape_cast %116 : vector<20x32xf32> to vector<2x10x32xf32>
      %cst_33 = arith.constant dense<0xFF800000> : vector<2x32xf32>
      %118 = vector.multi_reduction <maximumf>, %117, %cst_33 [1] : vector<2x10x32xf32> to vector<2x32xf32>
      %cst_34 = arith.constant 0.000000e+00 : f32
      %119 = vector.broadcast %cst_34 : f32 to vector<2x32xf32>
      %120 = tpu.concatenate %118, %119 in 1 : vector<2x32xf32>, vector<2x32xf32> -> vector<2x64xf32>
      %c0_35 = arith.constant 0 : index
      %c0_36 = arith.constant 0 : index
      %c0_37 = arith.constant 0 : index
      %121 = vector.load %arg11[%c0_35, %c0_36, %c0_37] : memref<1x2x64xf32, #tpu.memory_space<vmem>>, vector<1x2x64xf32>
      %122 = vector.shape_cast %121 : vector<1x2x64xf32> to vector<2x64xf32>
      %123 = vector.shape_cast %120 : vector<2x64xf32> to vector<1x2x64xf32>
      tpu.vector_store %arg11[%c0_35, %c0_36, %c0_37], %123 {strides = array<i32>} : memref<1x2x64xf32, #tpu.memory_space<vmem>>, vector<1x2x64xf32>,
    } else {
    }
    %c1_i32 = arith.constant 1 : i32
    %4 = arith.cmpi eq, %arg0, %c1_i32 : i32
    %5 = arith.extui %4 : i1 to i32
    %c0_i32_3 = arith.constant 0 : i32
    %6 = arith.cmpi ne, %5, %c0_i32_3 : i32
    scf.if %6 {
      %c0_4 = arith.constant 0 : index
      %c0_5 = arith.constant 0 : index
      %c0_6 = arith.constant 0 : index
      %7 = vector.load %arg5[%c0_4, %c0_5, %c0_6] : memref<2x96x32xf32, #tpu.memory_space<vmem>>, vector<2x96x32xf32>
      %c0_7 = arith.constant 0 : index
      %c0_8 = arith.constant 0 : index
      %c0_9 = arith.constant 0 : index
      %8 = vector.load %arg6[%c0_7, %c0_8, %c0_9] : memref<2x1x32xf32, #tpu.memory_space<vmem>>, vector<2x1x32xf32>
      %c0_10 = arith.constant 0 : index
      %c0_11 = arith.constant 0 : index
      %c0_12 = arith.constant 0 : index
      %9 = vector.load %arg7[%c0_10, %c0_11, %c0_12] : memref<2x1x32xf32, #tpu.memory_space<vmem>>, vector<2x1x32xf32>
      %10 = vector.extract_strided_slice %0 {offsets = [0, 0, 0], sizes = [2, 14, 32], strides = [1, 1, 1]} : vector<2x16x32xf32> to vector<2x14x32xf32>
      %11 = vector.extract_strided_slice %0 {offsets = [0, 1, 0], sizes = [2, 14, 32], strides = [1, 1, 1]} : vector<2x16x32xf32> to vector<2x14x32xf32>
      %12 = vector.extract_strided_slice %0 {offsets = [0, 2, 0], sizes = [2, 14, 32], strides = [1, 1, 1]} : vector<2x16x32xf32> to vector<2x14x32xf32>
      %13 = tpu.concatenate %10, %11, %12 in 2 : vector<2x14x32xf32>, vector<2x14x32xf32>, vector<2x14x32xf32> -> vector<2x14x96xf32>
      %14 = vector.shape_cast %13 : vector<2x14x96xf32> to vector<28x96xf32>
      %15 = vector.extract_strided_slice %7 {offsets = [0, 0, 0], sizes = [1, 96, 32], strides = [1, 1, 1]} : vector<2x96x32xf32> to vector<1x96x32xf32>
      %16 = vector.shape_cast %15 : vector<1x96x32xf32> to vector<96x32xf32>
      %cst = arith.constant dense<0.000000e+00> : vector<28x32xf32>
      %17 = tpu.matmul %14, %16, %cst {dimension_numbers = #tpu.dot_dimension_numbers<[1], [0], [0], [1], [0, 0, 1, 1], [], []>} : vector<28x96xf32>, vector<96x32xf32>, vector<28x32xf32> -> vector<28x32xf32>
      %cst_13 = arith.constant dense<0.000000e+00> : vector<32xf32>
      %18 = vector.multi_reduction <add>, %17, %cst_13 [0] : vector<28x32xf32> to vector<32xf32>
      %19 = vector.shape_cast %18 : vector<32xf32> to vector<1x32xf32>
      %cst_14 = arith.constant 2.800000e+01 : f32
      %20 = vector.broadcast %cst_14 : f32 to vector<1x32xf32>
      %21 = arith.divf %19, %20 : vector<1x32xf32>
      %22 = arith.mulf %17, %17 : vector<28x32xf32>
      %cst_15 = arith.constant dense<0.000000e+00> : vector<32xf32>
      %23 = vector.multi_reduction <add>, %22, %cst_15 [0] : vector<28x32xf32> to vector<32xf32>
      %24 = vector.shape_cast %23 : vector<32xf32> to vector<1x32xf32>
      %cst_16 = arith.constant 2.800000e+01 : f32
      %25 = vector.broadcast %cst_16 : f32 to vector<1x32xf32>
      %26 = arith.divf %24, %25 : vector<1x32xf32>
      %27 = arith.mulf %21, %21 : vector<1x32xf32>
      %28 = arith.subf %26, %27 : vector<1x32xf32>
      %cst_17 = arith.constant 9.99999974E-6 : f32
      %29 = vector.broadcast %cst_17 : f32 to vector<1x32xf32>
      %30 = arith.addf %28, %29 : vector<1x32xf32>
      %31 = math.rsqrt %30 : vector<1x32xf32>
      %32 = vector.extract_strided_slice %8 {offsets = [0, 0, 0], sizes = [1, 1, 32], strides = [1, 1, 1]} : vector<2x1x32xf32> to vector<1x1x32xf32>
      %33 = vector.shape_cast %32 : vector<1x1x32xf32> to vector<1x32xf32>
      %34 = arith.mulf %31, %33 : vector<1x32xf32>
      %35 = vector.extract_strided_slice %9 {offsets = [0, 0, 0], sizes = [1, 1, 32], strides = [1, 1, 1]} : vector<2x1x32xf32> to vector<1x1x32xf32>
      %36 = vector.shape_cast %35 : vector<1x1x32xf32> to vector<1x32xf32>
      %37 = arith.mulf %21, %34 : vector<1x32xf32>
      %38 = arith.subf %36, %37 : vector<1x32xf32>
      %39 = vector.broadcast %34 : vector<1x32xf32> to vector<28x32xf32>
      %40 = arith.mulf %17, %39 : vector<28x32xf32>
      %41 = vector.broadcast %38 : vector<1x32xf32> to vector<28x32xf32>
      %42 = arith.addf %40, %41 : vector<28x32xf32>
      %cst_18 = arith.constant 0.000000e+00 : f32
      %43 = vector.broadcast %cst_18 : f32 to vector<28x32xf32>
      %44 = arith.maximumf %42, %43 : vector<28x32xf32>
      %45 = vector.shape_cast %44 : vector<28x32xf32> to vector<2x14x32xf32>
      %46 = vector.extract_strided_slice %45 {offsets = [0, 0, 0], sizes = [2, 12, 32], strides = [1, 1, 1]} : vector<2x14x32xf32> to vector<2x12x32xf32>
      %47 = vector.extract_strided_slice %45 {offsets = [0, 1, 0], sizes = [2, 12, 32], strides = [1, 1, 1]} : vector<2x14x32xf32> to vector<2x12x32xf32>
      %48 = vector.extract_strided_slice %45 {offsets = [0, 2, 0], sizes = [2, 12, 32], strides = [1, 1, 1]} : vector<2x14x32xf32> to vector<2x12x32xf32>
      %49 = tpu.concatenate %46, %47, %48 in 2 : vector<2x12x32xf32>, vector<2x12x32xf32>, vector<2x12x32xf32> -> vector<2x12x96xf32>
      %50 = vector.shape_cast %49 : vector<2x12x96xf32> to vector<24x96xf32>
      %51 = vector.extract_strided_slice %7 {offsets = [1, 0, 0], sizes = [1, 96, 32], strides = [1, 1, 1]} : vector<2x96x32xf32> to vector<1x96x32xf32>
      %52 = vector.shape_cast %51 : vector<1x96x32xf32> to vector<96x32xf32>
      %cst_19 = arith.constant dense<0.000000e+00> : vector<24x32xf32>
      %53 = tpu.matmul %50, %52, %cst_19 {dimension_numbers = #tpu.dot_dimension_numbers<[1], [0], [0], [1], [0, 0, 1, 1], [], []>} : vector<24x96xf32>, vector<96x32xf32>, vector<24x32xf32> -> vector<24x32xf32>
      %cst_20 = arith.constant dense<0.000000e+00> : vector<32xf32>
      %54 = vector.multi_reduction <add>, %53, %cst_20 [0] : vector<24x32xf32> to vector<32xf32>
      %55 = vector.shape_cast %54 : vector<32xf32> to vector<1x32xf32>
      %cst_21 = arith.constant 2.400000e+01 : f32
      %56 = vector.broadcast %cst_21 : f32 to vector<1x32xf32>
      %57 = arith.divf %55, %56 : vector<1x32xf32>
      %58 = arith.mulf %53, %53 : vector<24x32xf32>
      %cst_22 = arith.constant dense<0.000000e+00> : vector<32xf32>
      %59 = vector.multi_reduction <add>, %58, %cst_22 [0] : vector<24x32xf32> to vector<32xf32>
      %60 = vector.shape_cast %59 : vector<32xf32> to vector<1x32xf32>
      %cst_23 = arith.constant 2.400000e+01 : f32
      %61 = vector.broadcast %cst_23 : f32 to vector<1x32xf32>
      %62 = arith.divf %60, %61 : vector<1x32xf32>
      %63 = arith.mulf %57, %57 : vector<1x32xf32>
      %64 = arith.subf %62, %63 : vector<1x32xf32>
      %cst_24 = arith.constant 9.99999974E-6 : f32
      %65 = vector.broadcast %cst_24 : f32 to vector<1x32xf32>
      %66 = arith.addf %64, %65 : vector<1x32xf32>
      %67 = math.rsqrt %66 : vector<1x32xf32>
      %68 = vector.extract_strided_slice %8 {offsets = [1, 0, 0], sizes = [1, 1, 32], strides = [1, 1, 1]} : vector<2x1x32xf32> to vector<1x1x32xf32>
      %69 = vector.shape_cast %68 : vector<1x1x32xf32> to vector<1x32xf32>
      %70 = arith.mulf %67, %69 : vector<1x32xf32>
      %71 = vector.extract_strided_slice %9 {offsets = [1, 0, 0], sizes = [1, 1, 32], strides = [1, 1, 1]} : vector<2x1x32xf32> to vector<1x1x32xf32>
      %72 = vector.shape_cast %71 : vector<1x1x32xf32> to vector<1x32xf32>
      %73 = arith.mulf %57, %70 : vector<1x32xf32>
      %74 = arith.subf %72, %73 : vector<1x32xf32>
      %75 = vector.broadcast %70 : vector<1x32xf32> to vector<24x32xf32>
      %76 = arith.mulf %53, %75 : vector<24x32xf32>
      %77 = vector.broadcast %74 : vector<1x32xf32> to vector<24x32xf32>
      %78 = arith.addf %76, %77 : vector<24x32xf32>
      %cst_25 = arith.constant 0.000000e+00 : f32
      %79 = vector.broadcast %cst_25 : f32 to vector<24x32xf32>
      %80 = arith.maximumf %78, %79 : vector<24x32xf32>
      %81 = vector.shape_cast %80 : vector<24x32xf32> to vector<2x12x32xf32>
      %cst_26 = arith.constant dense<0xFF800000> : vector<2x32xf32>
      %82 = vector.multi_reduction <maximumf>, %81, %cst_26 [1] : vector<2x12x32xf32> to vector<2x32xf32>
      %c0_27 = arith.constant 0 : index
      %c0_28 = arith.constant 0 : index
      %c0_29 = arith.constant 0 : index
      %83 = vector.load %arg2[%c0_27, %c0_28, %c0_29] : memref<1x96x32xf32, #tpu.memory_space<vmem>>, vector<1x96x32xf32>
      %c0_30 = arith.constant 0 : index
      %c0_31 = arith.constant 0 : index
      %c0_32 = arith.constant 0 : index
      %84 = vector.load %arg3[%c0_30, %c0_31, %c0_32] : memref<1x1x32xf32, #tpu.memory_space<vmem>>, vector<1x1x32xf32>
      %c0_33 = arith.constant 0 : index
      %c0_34 = arith.constant 0 : index
      %c0_35 = arith.constant 0 : index
      %85 = vector.load %arg4[%c0_33, %c0_34, %c0_35] : memref<1x1x32xf32, #tpu.memory_space<vmem>>, vector<1x1x32xf32>
      %86 = vector.extract_strided_slice %0 {offsets = [0, 0, 0], sizes = [2, 14, 32], strides = [1, 1, 1]} : vector<2x16x32xf32> to vector<2x14x32xf32>
      %87 = vector.extract_strided_slice %0 {offsets = [0, 1, 0], sizes = [2, 14, 32], strides = [1, 1, 1]} : vector<2x16x32xf32> to vector<2x14x32xf32>
      %88 = vector.extract_strided_slice %0 {offsets = [0, 2, 0], sizes = [2, 14, 32], strides = [1, 1, 1]} : vector<2x16x32xf32> to vector<2x14x32xf32>
      %89 = tpu.concatenate %86, %87, %88 in 2 : vector<2x14x32xf32>, vector<2x14x32xf32>, vector<2x14x32xf32> -> vector<2x14x96xf32>
      %90 = vector.shape_cast %89 : vector<2x14x96xf32> to vector<28x96xf32>
      %91 = vector.shape_cast %83 : vector<1x96x32xf32> to vector<96x32xf32>
      %cst_36 = arith.constant dense<0.000000e+00> : vector<28x32xf32>
      %92 = tpu.matmul %90, %91, %cst_36 {dimension_numbers = #tpu.dot_dimension_numbers<[1], [0], [0], [1], [0, 0, 1, 1], [], []>} : vector<28x96xf32>, vector<96x32xf32>, vector<28x32xf32> -> vector<28x32xf32>
      %cst_37 = arith.constant dense<0.000000e+00> : vector<32xf32>
      %93 = vector.multi_reduction <add>, %92, %cst_37 [0] : vector<28x32xf32> to vector<32xf32>
      %94 = vector.shape_cast %93 : vector<32xf32> to vector<1x32xf32>
      %cst_38 = arith.constant 2.800000e+01 : f32
      %95 = vector.broadcast %cst_38 : f32 to vector<1x32xf32>
      %96 = arith.divf %94, %95 : vector<1x32xf32>
      %97 = arith.mulf %92, %92 : vector<28x32xf32>
      %cst_39 = arith.constant dense<0.000000e+00> : vector<32xf32>
      %98 = vector.multi_reduction <add>, %97, %cst_39 [0] : vector<28x32xf32> to vector<32xf32>
      %99 = vector.shape_cast %98 : vector<32xf32> to vector<1x32xf32>
      %cst_40 = arith.constant 2.800000e+01 : f32
      %100 = vector.broadcast %cst_40 : f32 to vector<1x32xf32>
      %101 = arith.divf %99, %100 : vector<1x32xf32>
      %102 = arith.mulf %96, %96 : vector<1x32xf32>
      %103 = arith.subf %101, %102 : vector<1x32xf32>
      %cst_41 = arith.constant 9.99999974E-6 : f32
      %104 = vector.broadcast %cst_41 : f32 to vector<1x32xf32>
      %105 = arith.addf %103, %104 : vector<1x32xf32>
      %106 = math.rsqrt %105 : vector<1x32xf32>
      %107 = vector.shape_cast %84 : vector<1x1x32xf32> to vector<1x32xf32>
      %108 = arith.mulf %106, %107 : vector<1x32xf32>
      %109 = vector.shape_cast %85 : vector<1x1x32xf32> to vector<1x32xf32>
      %110 = arith.mulf %96, %108 : vector<1x32xf32>
      %111 = arith.subf %109, %110 : vector<1x32xf32>
      %112 = vector.broadcast %108 : vector<1x32xf32> to vector<28x32xf32>
      %113 = arith.mulf %92, %112 : vector<28x32xf32>
      %114 = vector.broadcast %111 : vector<1x32xf32> to vector<28x32xf32>
      %115 = arith.addf %113, %114 : vector<28x32xf32>
      %cst_42 = arith.constant 0.000000e+00 : f32
      %116 = vector.broadcast %cst_42 : f32 to vector<28x32xf32>
      %117 = arith.maximumf %115, %116 : vector<28x32xf32>
      %118 = vector.shape_cast %117 : vector<28x32xf32> to vector<2x14x32xf32>
      %cst_43 = arith.constant dense<0xFF800000> : vector<2x32xf32>
      %119 = vector.multi_reduction <maximumf>, %118, %cst_43 [1] : vector<2x14x32xf32> to vector<2x32xf32>
      %120 = tpu.concatenate %82, %119 in 1 : vector<2x32xf32>, vector<2x32xf32> -> vector<2x64xf32>
      %c0_44 = arith.constant 0 : index
      %c0_45 = arith.constant 0 : index
      %c0_46 = arith.constant 0 : index
      %121 = vector.load %arg11[%c0_44, %c0_45, %c0_46] : memref<1x2x64xf32, #tpu.memory_space<vmem>>, vector<1x2x64xf32>
      %122 = vector.shape_cast %121 : vector<1x2x64xf32> to vector<2x64xf32>
      %123 = vector.shape_cast %120 : vector<2x64xf32> to vector<1x2x64xf32>
      tpu.vector_store %arg11[%c0_44, %c0_45, %c0_46], %123 {strides = array<i32>} : memref<1x2x64xf32, #tpu.memory_space<vmem>>, vector<1x2x64xf32>,
    } else {
    }
    return
  }
  func.func @transform_0(%arg0: i32) -> (i32, i32, i32) {
    %c0_i32 = arith.constant 0 : i32
    %c0_i32_0 = arith.constant 0 : i32
    %c0_i32_1 = arith.constant 0 : i32
    %c0_i32_2 = arith.constant 0 : i32
    return %c0_i32, %c0_i32_0, %c0_i32_1 : i32, i32, i32
  }
  func.func @transform_1(%arg0: i32) -> (i32, i32, i32) {
    %c0_i32 = arith.constant 0 : i32
    %c0_i32_0 = arith.constant 0 : i32
    %c0_i32_1 = arith.constant 0 : i32
    %c0_i32_2 = arith.constant 0 : i32
    return %c0_i32, %c0_i32_0, %c0_i32_1 : i32, i32, i32
  }
  func.func @transform_2(%arg0: i32) -> (i32, i32, i32) {
    %c0_i32 = arith.constant 0 : i32
    %c0_i32_0 = arith.constant 0 : i32
    %c0_i32_1 = arith.constant 0 : i32
    %c0_i32_2 = arith.constant 0 : i32
    return %c0_i32, %c0_i32_0, %c0_i32_1 : i32, i32, i32
  }
  func.func @transform_3(%arg0: i32) -> (i32, i32, i32) {
    %c0_i32 = arith.constant 0 : i32
    %c0_i32_0 = arith.constant 0 : i32
    %c0_i32_1 = arith.constant 0 : i32
    %c0_i32_2 = arith.constant 0 : i32
    return %c0_i32, %c0_i32_0, %c0_i32_1 : i32, i32, i32
  }
  func.func @transform_4(%arg0: i32) -> (i32, i32, i32) {
    %c0_i32 = arith.constant 0 : i32
    %c0_i32_0 = arith.constant 0 : i32
    %c0_i32_1 = arith.constant 0 : i32
    %c0_i32_2 = arith.constant 0 : i32
    return %c0_i32, %c0_i32_0, %c0_i32_1 : i32, i32, i32
  }
  func.func @transform_5(%arg0: i32) -> (i32, i32, i32) {
    %c0_i32 = arith.constant 0 : i32
    %c0_i32_0 = arith.constant 0 : i32
    %c0_i32_1 = arith.constant 0 : i32
    %c0_i32_2 = arith.constant 0 : i32
    return %c0_i32, %c0_i32_0, %c0_i32_1 : i32, i32, i32
  }
  func.func @transform_6(%arg0: i32) -> (i32, i32, i32) {
    %c0_i32 = arith.constant 0 : i32
    %c0_i32_0 = arith.constant 0 : i32
    %c0_i32_1 = arith.constant 0 : i32
    %c0_i32_2 = arith.constant 0 : i32
    return %c0_i32, %c0_i32_0, %c0_i32_1 : i32, i32, i32
  }
  func.func @transform_7(%arg0: i32) -> (i32, i32, i32) {
    %c0_i32 = arith.constant 0 : i32
    %c0_i32_0 = arith.constant 0 : i32
    %c0_i32_1 = arith.constant 0 : i32
    %c0_i32_2 = arith.constant 0 : i32
    return %c0_i32, %c0_i32_0, %c0_i32_1 : i32, i32, i32
  }
  func.func @transform_8(%arg0: i32) -> (i32, i32, i32) {
    %c0_i32 = arith.constant 0 : i32
    %c0_i32_0 = arith.constant 0 : i32
    %c0_i32_1 = arith.constant 0 : i32
    %c0_i32_2 = arith.constant 0 : i32
    return %c0_i32, %c0_i32_0, %c0_i32_1 : i32, i32, i32
  }
  func.func @transform_9(%arg0: i32) -> (i32, i32, i32) {
    %c0_i32 = arith.constant 0 : i32
    %c0_i32_0 = arith.constant 0 : i32
    %c0_i32_1 = arith.constant 0 : i32
    %c0_i32_2 = arith.constant 0 : i32
    return %c0_i32, %c0_i32_0, %c0_i32_1 : i32, i32, i32
  }
  func.func @transform_10(%arg0: i32) -> (i32, i32, i32) {
    %c0_i32 = arith.constant 0 : i32
    %c0_i32_0 = arith.constant 0 : i32
    %c0_i32_1 = arith.constant 0 : i32
    return %arg0, %c0_i32, %c0_i32_0 : i32, i32, i32
  }
}

</mosaic_0001>

<bundles_post_ra>
// kernel: tpu_custom_call.1
= control target key start
LH: loop header
LB: loop body
LE: loop exit
PB: predicated region body
PF: predicated region fallthrough
CT: control target
= control target key end

     0   :  { %s4141_s0 = inlined_call_operand.vmem [shape: f32[2,16,32], index: 0, kind: input, shape index: {}]   ;;  %s4142_s1 = inlined_call_operand.vmem [shape: f32[1,96,32], index: 1, kind: input, shape index: {}]   ;;  %s4143_s2 = inlined_call_operand.vmem [shape: f32[1,1,32], index: 2, kind: input, shape index: {}]   ;;  %s4144_s3 = inlined_call_operand.vmem [shape: f32[1,1,32], index: 3, kind: input, shape index: {}]   ;;  %s4145_s4 = inlined_call_operand.vmem [shape: f32[2,96,32], index: 4, kind: input, shape index: {}]   ;;  %s4146_s5 = inlined_call_operand.vmem [shape: f32[2,1,32], index: 5, kind: input, shape index: {}]   ;;  %s4147_s6 = inlined_call_operand.vmem [shape: f32[2,1,32], index: 6, kind: input, shape index: {}]   ;;  %s4148_s7 = inlined_call_operand.vmem [shape: f32[3,96,32], index: 7, kind: input, shape index: {}]   ;;  %s4149_s8 = inlined_call_operand.vmem [shape: f32[3,1,32], index: 8, kind: input, shape index: {}]   ;;  %s4150_s9 = inlined_call_operand.vmem [shape: f32[3,1,32], index: 9, kind: input, shape index: {}]   ;;  %s4151_s10 = inlined_call_operand.hbm [shape: f32[2,2,64], index: 10, kind: output, shape index: {}]  }
   0x1   :  { %4153 = sst [smem:[#allocation5_spill]] %s4141_s0 }
   0x2   :  { %15 = vsyncpa [#allocation3], 0 }
   0x3   :  { %17 = vsyncpa [#allocation3 + $0x1], 0  ;;  %s3215_s13 = smov 0   ;;  %s3217_s14 = smov 0  }
   0x4   :  { %s3219_s15 = smov 0   ;;  %s3221_s16 = smov 0  }
   0x5 LB: > { %s3236_s17 = sadd.s32 4294967295, %s3147_s16   ;;  %s2665_s18 = sadd.s32 4294967294, %s3147_s16   ;;  %s3147_s16 = sphi %s3221_s16, %s4161_s16   ;;  %s3143_s15 = sphi %s3219_s15, %s4160_s15   ;;  %s3139_s14 = sphi %s3217_s14, %s4159_s14   ;;  %s3135_s13 = sphi %s3215_s13, %s4158_s13  }
   0x6   : > { %s3240_s19 = sadd.s32 1, %s3147_s16   ;;  %s240_s20 = sadd.s32 1, %s3143_s15 }
   0x7   : > { %s237_s21 = ssub.s32 %s3147_s16, %s3240_s19  ;;  %p250_p0 = scmp.ne.s32.totalorder %s3143_s15, %s3139_s14 }
   0x8   : > { %p238_p1 = scmp.eq.s32.totalorder %s237_s21, 0  ;;  %p251_p2 = scmp.eq.s32.totalorder %s3236_s17, 1 }
   0x9   : > { %p256_p3 = scmp.ne.s32.totalorder %s3139_s14, %s3135_s13  ;;  %p257_p4 = scmp.eq.s32.totalorder %s2665_s18, 1 }
   0xa   : > { %s3251_s22 = scalar_select %p238_p1, %s3143_s15, %s240_s20  }
   0xb   : > { %p3253_p5 = por %p251_p2, %p250_p0  ;;  %p3257_p6 = por %p257_p4, %p256_p3 }
   0xc   : > { %p2667_p7 = scmp.ge.s32.totalorder %s3147_s16, 1  ;;  %p305_p8 = scmp.lt.s32.totalorder %s3147_s16, 3 }
   0xe   : > { %p306_p9 = pnand %p2667_p7, %p305_p8 }
   0xf   : > { %s4152_s25 = sand.u32 (!%p306_p9), 1, %s3139_s14   ;;  %s4156_s0 = sld [smem:[#allocation5_spill]] (!%p306_p9) }
  0x10   : > { %309 = sbr.rel (%p306_p9) target bundleno = 2187 (0x88b), region = 60  ;;  %s2668_s12 = sshll.u32 (!%p306_p9), %s4152_s25, 1 }
  0x11   : > { %s3286_s21 = scalar_lea.vmem (!%p306_p9), [#allocation2], %s2668_s12  ;;  %p2669_p10 = scmp.ne.s32.totalorder (!%p306_p9), %s3236_s17, 0 }
  0x15   : > { %v3267_v0 = vld [vmem:[%s4156_s0] sm:$0xff]  ;;  %v3272_v1 = vld [vmem:[%s4156_s0 + $0x8] sm:$0xff]  ;;  %v3277_v2 = vld [vmem:[%s4156_s0 + $0x10] sm:$0xff]  ;;  %345 = sbr.rel (%p2669_p10) target bundleno = 1217 (0x4c1), region = 64  ;;  %s3149_s30 = smov (!%p2669_p10), 32  }
  0x16   : > { %v3284_v3 = vld [vmem:[%s4156_s0 + $0x18] sm:$0xff]  ;;  %s3150_s26 = smov (!%p2669_p10), 64  }
  0x1a   : > { %v394_v4 = vrot.slane %v3272_v1, 1  ;;  %vm392_vm0 = vcmask 1046528   ;;  %v393_v5 = vrot.slane %v3267_v0, 1  ;;  %v396_v6 = vrot.slane %v3277_v2, 1  ;;  %v357_v10 = vld [vmem:[%s4148_s7 + $0x58] sm:$0xff]  ;;  %v356_v11 = vld [vmem:[%s4148_s7 + $0x50] sm:$0xff] }
  0x1b   : > { %v397_v7 = vrot.slane %v3284_v3, 1  ;;  %vm411_vm1 = vcmask 1045504   ;;  %v412_v8 = vrot.slane %v3267_v0, 2  ;;  %v413_v9 = vrot.slane %v3272_v1, 2  ;;  %2789 = vmatprep.subr.mxu0 %v357_v10  ;;  %v355_v16 = vld [vmem:[%s4148_s7 + $0x48] sm:$0xff]  ;;  %v354_v18 = vld [vmem:[%s4148_s7 + $0x40] sm:$0xff] }
  0x1c   : > { %401 = vrot.lane.b32.xlu1 %v394_v4, %s3149_s30  ;;  %v395_v12 = vsel %vm392_vm0, %v393_v5, %v394_v4  ;;  %v415_v14 = vrot.slane %v3277_v2, 2  ;;  %v416_v15 = vrot.slane %v3284_v3, 2  ;;  %2790 = vmatpush3.msra.mxu0 %v357_v10  ;;  %v353_v20 = vld [vmem:[%s4148_s7 + $0x38] sm:$0xff]  ;;  %v352_v21 = vld [vmem:[%s4148_s7 + $0x30] sm:$0xff]  ;;  %v351_v22 = vld [vmem:[%s4148_s7 + $0x28] sm:$0xff]  ;;  %v448_v30 = vlaneseq }
  0x1d   : > { %399 = vrot.lane.b32.xlu0 %v395_v12, %s3149_s30  ;;  %v398_v13 = vsel %vm392_vm0, %v396_v6, %v397_v7  ;;  %v414_v17 = vsel %vm411_vm1, %v412_v8, %v413_v9  ;;  %2791 = vmatprep.subr.mxu0 %v356_v11  ;;  %v350_v23 = vld [vmem:[%s4148_s7 + $0x20] sm:$0xff]  ;;  %v349_v24 = vld [vmem:[%s4148_s7 + $0x18] sm:$0xff]  ;;  %v348_v25 = vld [vmem:[%s4148_s7 + $0x10] sm:$0xff]  ;;  %v3151_v28 = vmov 1983009808   ;;  %vm430_vm2 = vcmask 261120  }
  0x1e   : > { %2792 = vmatpush3.msra.mxu0 %v356_v11  ;;  %v417_v19 = vsel %vm411_vm1, %v415_v14, %v416_v15  ;;  %v347_v26 = vld [vmem:[%s4148_s7 + $0x8] sm:$0xff]  ;;  %v346_v27 = vld [vmem:[%s4148_s7] sm:$0xff]  ;;  %v446_v29 = vunpack.c.l.s4 %v3151_v28  ;;  %v3345_v32 = vshrl.u32 %v448_v30, 7  ;;  %vm435_vm3 = vcmask 523264   ;;  %v365_v30 = vld [vmem:[%s4148_s7 + $0x98] sm:$0xff] }
  0x1f   : > { %2793 = vmatprep.subr.mxu0 %v355_v16  ;;  %vm569_vm4 = vcmask 785408   ;;  %v367_v28 = vld [vmem:[%s4148_s7 + $0xa8] sm:$0xff]  ;;  %vm668_vm5 = vcmask 257024   ;;  %vm3153_vm6 = vmmov 0   ;;  %vm1483_vm7 = vcmask 254976  }
  0x20   : > { %403 = vrot.lane.b32.xlu1 %v398_v13, %s3149_s30  ;;  %2794 = vmatpush3.msra.mxu0 %v355_v16  ;;  %v447_v31 = vunpack.c.0.s8 %v446_v29  ;;  %v366_v29 = vld [vmem:[%s4148_s7 + $0xa0] sm:$0xff]  ;;  %vm1503_vm8 = vcmask 1041409   ;;  %vm1507_vm9 = vcmask 517120  }
  0x21   : > { %418 = vrot.lane.b32.xlu0 %v414_v17, %s3150_s26  ;;  %2795 = vmatprep.subr.mxu0 %v354_v18 }
  0x22   : > { %2796 = vmatpush3.msra.mxu0 %v354_v18  ;;  %v3348_v35 = vsub.s32 %v447_v31, %v3345_v32  ;;  %v364_v31 = vld [vmem:[%s4148_s7 + $0x90] sm:$0xff] }
  0x23   : > { %2797 = vmatprep.subr.mxu0 %v353_v20 }
  0x24   : > { %422 = vrot.lane.b32.xlu1 %v417_v19, %s3150_s26  ;;  %2798 = vmatpush3.msra.mxu0 %v353_v20 }
  0x25   : > { %420 = vrot.lane.b32.xlu0 %v413_v9, %s3150_s26  ;;  %2799 = vmatprep.subr.mxu0 %v352_v21 }
  0x26   : > { %2800 = vmatpush3.msra.mxu0 %v352_v21 }
  0x27   : > { %2801 = vmatprep.subr.mxu0 %v351_v22 }
  0x28   : > { %424 = vrot.lane.b32.xlu1 %v416_v15, %s3150_s26  ;;  %2802 = vmatpush3.msra.mxu0 %v351_v22 }
  0x29   : > { %405 = vrot.lane.b32.xlu0 %v397_v7, %s3149_s30  ;;  %2803 = vmatprep.subr.mxu0 %v350_v23 }
  0x2a   : > { %2804 = vmatpush3.msra.mxu0 %v350_v23 }
  0x2b   : > { %2805 = vmatprep.subr.mxu0 %v349_v24 }
  0x2c   : > { %2806 = vmatpush3.msra.mxu0 %v349_v24 }
  0x2d   : > { %2807 = vmatprep.subr.mxu0 %v348_v25 }
  0x2e   : > { %2808 = vmatpush3.msra.mxu0 %v348_v25  ;;  %v369_v25 = vld [vmem:[%s4148_s7 + $0xb8] sm:$0xff] }
  0x2f   : > { %2809 = vmatprep.subr.mxu0 %v347_v26 }
  0x30   : > { %2810 = vmatpush3.msra.mxu0 %v347_v26  ;;  %v3152_v26 = vmov 0.0  }
  0x31   : > { %2811 = vmatprep.subr.mxu0 %v346_v27  ;;  %2819 = vmatprep.subr.mxu1 %v3152_v26 }
  0x32   : > { %2812 = vmatpush3.msra.mxu0 %v346_v27  ;;  %v368_v27 = vld [vmem:[%s4148_s7 + $0xb0] sm:$0xff]  ;;  %2820 = vmatpush3.msra.mxu1 %v369_v25 }
  0x33   : > { %2852 = vmatprep.subr.mxu0 %v3152_v26  ;;  %2821 = vmatprep.subr.mxu1 %v3152_v26 }
  0x34   : > { %2822 = vmatpush3.msra.mxu1 %v368_v27  ;;  %2843 = vmatprep.mubr.msk.f32.mxu1 %vm3153_vm6, %v3152_v26 }
  0x35   : > { %2823 = vmatprep.subr.mxu1 %v3152_v26 }
  0x36   : > { %2824 = vmatpush3.msra.mxu1 %v367_v28 }
  0x37   : > { %2825 = vmatprep.subr.mxu1 %v3152_v26 }
  0x38   : > { %2826 = vmatpush3.msra.mxu1 %v366_v29 }
  0x39   : > { %2827 = vmatprep.subr.mxu1 %v3152_v26 }
  0x3a   : > { %2828 = vmatpush3.msra.mxu1 %v365_v30 }
  0x3b   : > { %2829 = vmatprep.subr.mxu1 %v3152_v26 }
  0x3c   : > { %2830 = vmatpush3.msra.mxu1 %v364_v31 }
  0x3d   : > { %2831 = vmatprep.subr.mxu1 %v3152_v26 }
  0x8e   : > { %v402_v33 = vpop.permute.xlu1 %401 }
  0x8f   : > { %v400_v34 = vpop.permute.xlu0 %399  ;;  %v432_v44 = vsel %vm430_vm2, %v3272_v1, %v402_v33  ;;  %v363_v33 = vld [vmem:[%s4148_s7 + $0x88] sm:$0xff] }
  0x90   : > { %v431_v37 = vsel %vm430_vm2, %v3267_v0, %v400_v34  ;;  %2832 = vmatpush3.msra.mxu1 %v363_v33 }
  0x91   : > { %2833 = vmatprep.subr.mxu1 %v3152_v26 }
  0x92   : > { %v404_v36 = vpop.permute.xlu1 %403 }
  0x93   : > { %v419_v38 = vpop.permute.xlu0 %418  ;;  %v433_v39 = vsel %vm430_vm2, %v3277_v2, %v404_v36 }
  0x94   : > { %v436_v40 = vsel %vm435_vm3, %v431_v37, %v419_v38 }
  0x95   : > { %v444_v41 = vcombine.high %v436_v40, %v436_v40  ;;  %v451_v42 = vrot.slane %v436_v40, %v3348_v35 }
  0x96   : > { %v423_v43 = vpop.permute.xlu1 %422 }
  0x97   : > { %v458_v45 = vrot.slane %v444_v41, %v3348_v35  ;;  %v459_v46 = vcombine.high %v451_v42, %v451_v42  ;;  %v438_v47 = vsel %vm435_vm3, %v433_v39, %v423_v43  ;;  %v421_v48 = vpop.permute.xlu0 %420 }
  0x98   : > { %v477_v49 = vcombine.high %v438_v47, %v438_v47  ;;  %v484_v50 = vrot.slane %v438_v47, %v3348_v35  ;;  %v437_v51 = vsel %vm435_vm3, %v432_v44, %v421_v48 }
  0x99   : > { %v460_v52 = vcombine.high %v458_v45, %v458_v45  ;;  %v510_v53 = vcombine.low %v451_v42, %v459_v46  ;;  %v461_v54 = vcombine.high %v437_v51, %v437_v51  ;;  %v468_v55 = vrot.slane %v437_v51, %v3348_v35 }
  0x9a   : > { %v491_v56 = vrot.slane %v477_v49, %v3348_v35  ;;  %v492_v57 = vcombine.high %v484_v50, %v484_v50  ;;  %v425_v58 = vpop.permute.xlu1 %424 }
  0x9b   : > { %v475_v59 = vrot.slane %v461_v54, %v3348_v35  ;;  %v476_v60 = vcombine.high %v468_v55, %v468_v55  ;;  %v406_v61 = vpop.permute.xlu0 %405  ;;  %v511_v62 = vcombine.low %v458_v45, %v460_v52  ;;  %v518_v4 = vrot.slane %v510_v53, %v3348_v35 }
  0x9c   : > { %v434_v63 = vsel %vm430_vm2, %v3284_v3, %v406_v61  ;;  %v544_v9 = vcombine.low %v492_v57, %v491_v56  ;;  %v493_v10 = vcombine.high %v491_v56, %v491_v56 }
  0x9d   : > { %v527_v5 = vcombine.low %v468_v55, %v476_v60  ;;  %v528_v6 = vcombine.low %v475_v59, %v484_v50  ;;  %v439_v7 = vsel %vm435_vm3, %v434_v63, %v425_v58  ;;  %v525_v8 = vrot.slane %v511_v62, %v3348_v35 }
  0x9e   : > { %v494_v11 = vcombine.high %v439_v7, %v439_v7  ;;  %v501_v12 = vrot.slane %v439_v7, %v3348_v35  ;;  %v552_v20 = vrot.slane %v544_v9, %v3348_v35 }
  0x9f   : > { %v535_v13 = vrot.slane %v527_v5, %v3348_v35  ;;  %v542_v14 = vrot.slane %v528_v6, %v3348_v35  ;;  %v526_v15 = vcombine.low %v518_v4, %v525_v8 }
  0xa0   : > { %v508_v16 = vrot.slane %v494_v11, %v3348_v35  ;;  %v509_v17 = vcombine.high %v501_v12, %v501_v12  ;;  %v545_v18 = vcombine.low %v493_v10, %v501_v12 }
  0xa1   : > { %2813 = vmatprep.mubr.msk.f32.mxu0 %vm569_vm4, %v526_v15  ;;  %v543_v19 = vcombine.low %v535_v13, %v542_v14  ;;  %v382_v14 = vld [vmem:[%s4149_s8] sm:$0x1]  ;;  %v3423_v15 = vsub.s32 0, %v3345_v32 }
  0xa2   : > { %v559_v21 = vrot.slane %v545_v18, %v3348_v35  ;;  %v561_v22 = vcombine.low %v509_v17, %v508_v16  ;;  %v385_v18 = vld [vmem:[%s4150_s9] sm:$0x1] }
  0xa3   : > { %2814 = vmatmul.mubr.msk.f32.vlgmr.msra.gmra.mxu0 %vm569_vm4, %v543_v19 }
  0xa4   : > { %v560_v23 = vcombine.low %v552_v20, %v559_v21  ;;  %v568_v24 = vrot.slane %v561_v22, %v3348_v35 }
  0xa6   : > { %2816 = vmatprep.mubr.msk.f32.mxu0 %vm569_vm4, %v560_v23 }
  0xa7   : > { %2817 = vmatmul.mubr.msk.f32.gmra.mxu0 %vm569_vm4, %v568_v24 }
  0xa8   : > { %2876 = vmatprep.mubr.msk.f32.mxu0 %vm3153_vm6, %v3152_v26 }
 0x163   : > { %v2815_v34 = vpop.f32.mrf.mxu0 }
 0x164   : > { %v680_v37 = vmul.f32 %v2815_v34, %v2815_v34  ;;  %v664_v41 = vsel %vm430_vm2, %v2815_v34, 0.0 }
 0x165   : > { %v644_v36 = vpop.f32.mrf.mxu0 }
 0x166   : > { %v663_v38 = vsel %vm430_vm2, %v644_v36, 0.0  ;;  %v679_v39 = vmul.f32 %v644_v36, %v644_v36  ;;  %v684_v45 = vsel %vm430_vm2, %v680_v37, 0.0 }
 0x167   : > { %v2818_v40 = vpop.f32.mrf.mxu0  ;;  %v665_v43 = vadd.f32 %v664_v41, %v663_v38 }
 0x168   : > { %v683_v42 = vsel %vm430_vm2, %v679_v39, 0.0  ;;  %v682_v46 = vmul.f32 %v2818_v40, %v2818_v40  ;;  %v669_v51 = vsel %vm668_vm5, %v2818_v40, 0.0  ;;  %v362_v39 = vld [vmem:[%s4148_s7 + $0x80] sm:$0xff] }
 0x169   : > { %v654_v44 = vpop.f32.mrf.mxu0  ;;  %v685_v49 = vadd.f32 %v684_v45, %v683_v42  ;;  %2834 = vmatpush3.msra.mxu1 %v362_v39 }
 0x16a   : > { %v666_v47 = vsel %vm430_vm2, %v654_v44, 0.0  ;;  %v681_v48 = vmul.f32 %v654_v44, %v654_v44  ;;  %v688_v55 = vsel %vm668_vm5, %v682_v46, 0.0  ;;  %2835 = vmatprep.subr.mxu1 %v3152_v26 }
 0x16b   : > { %v667_v50 = vadd.f32 %v666_v47, %v665_v43 }
 0x16c   : > { %v686_v52 = vsel %vm430_vm2, %v681_v48, 0.0 }
 0x16d   : > { %v670_v53 = vadd.f32 %v669_v51, %v667_v50  ;;  %v687_v54 = vadd.f32 %v686_v52, %v685_v49 }
 0x16f   : > { %v671_v56 = vrot.slane %v670_v53, 4  ;;  %v689_v57 = vadd.f32 %v688_v55, %v687_v54 }
 0x171   : > { %v672_v58 = vadd.f32 %v671_v56, %v670_v53  ;;  %v690_v59 = vrot.slane %v689_v57, 4 }
 0x173   : > { %v673_v60 = vrot.slane %v672_v58, 2  ;;  %v691_v61 = vadd.f32 %v690_v59, %v689_v57 }
 0x175   : > { %v674_v62 = vadd.f32 %v673_v60, %v672_v58  ;;  %v692_v63 = vrot.slane %v691_v61, 2 }
 0x177   : > { %v675_v4 = vrot.slane %v674_v62, 1  ;;  %v693_v5 = vadd.f32 %v692_v63, %v691_v61  ;;  %v360_v63 = vld [vmem:[%s4148_s7 + $0x70] sm:$0xff] }
 0x179   : > { %v676_v6 = vadd.f32 %v675_v4, %v674_v62  ;;  %v694_v7 = vrot.slane %v693_v5, 1  ;;  %v359_v4 = vld [vmem:[%s4148_s7 + $0x68] sm:$0xff] }
 0x17b   : > { %v678_v8 = vmul.f32 0.035714287, %v676_v6  ;;  %v695_v9 = vadd.f32 %v694_v7, %v693_v5 }
 0x17d   : > { %v696_v10 = vmul.f32 0.035714287, %v695_v9  ;;  %v697_v11 = vmul.f32 %v678_v8, %v678_v8 }
 0x17f   : > { %v698_v12 = vsub.f32 %v696_v10, %v697_v11 }
 0x181   : > { %v699_v13 = vadd.f32 1e-05, %v698_v12 }
 0x183   : > { %3075 = vrsqrt.f32 %v699_v13  ;;  %v358_v13 = vld [vmem:[%s4148_s7 + $0x60] sm:$0xff] }
 0x190   : > { %v3076_v16 = vpop.eup %3075 }
 0x191   : > { %v701_v17 = vmul.f32 %v3076_v16, %v382_v14 }
 0x193   : > { %v702_v19 = vmul.f32 %v701_v17, %v678_v8  ;;  %v707_v20 = vrot.slane %v701_v17, %v3423_v15 }
 0x195   : > { %v703_v21 = vsub.f32 %v385_v18, %v702_v19  ;;  %v710_v22 = vmul.f32 %v707_v20, %v654_v44  ;;  %v711_v23 = vmul.f32 %v2818_v40, %v707_v20  ;;  %v708_v25 = vmul.f32 %v707_v20, %v644_v36  ;;  %v361_v40 = vld [vmem:[%s4148_s7 + $0x78] sm:$0xff] }
 0x196   : > { %v709_v27 = vmul.f32 %v2815_v34, %v707_v20  ;;  %2836 = vmatpush3.msra.mxu1 %v361_v40 }
 0x197   : > { %v716_v24 = vrot.slane %v703_v21, %v3423_v15  ;;  %2837 = vmatprep.subr.mxu1 %v3152_v26 }
 0x198   : > { %2838 = vmatpush3.msra.mxu1 %v360_v63  ;;  %v379_v63 = vld [vmem:[%s4148_s7 + $0x108] sm:$0xff] }
 0x199   : > { %v720_v28 = vadd.f32 %v716_v24, %v710_v22  ;;  %v718_v29 = vadd.f32 %v716_v24, %v708_v25  ;;  %v719_v32 = vadd.f32 %v716_v24, %v709_v27  ;;  %v721_v30 = vadd.f32 %v716_v24, %v711_v23  ;;  %2839 = vmatprep.subr.mxu1 %v3152_v26 }
 0x19a   : > { %2840 = vmatpush3.msra.mxu1 %v359_v4 }
 0x19b   : > { %v724_v31 = vmax.f32 %v720_v28, 0.0  ;;  %v722_v33 = vmax.f32 %v718_v29, 0.0  ;;  %v723_v37 = vmax.f32 %v719_v32, 0.0  ;;  %v725_v38 = vmax.f32 %v721_v30, 0.0  ;;  %2841 = vmatprep.subr.mxu1 %v3152_v26 }
 0x19c   : > { %2842 = vmatpush3.msra.mxu1 %v358_v13 }
 0x19d   : > { %v764_v41 = vcombine.high %v724_v31, %v724_v31  ;;  %v3437_v34 = vrot.slane %v724_v31, %v3348_v35  ;;  %v730_v36 = vcombine.high %v722_v33, %v722_v33  ;;  %v737_v42 = vrot.slane %v722_v33, %v3348_v35  ;;  %2978 = vmatprep.subr.mxu1 %v3152_v26 }
 0x19e   : > { %v754_v43 = vrot.slane %v723_v37, %v3348_v35  ;;  %v747_v44 = vcombine.high %v723_v37, %v723_v37  ;;  %v3443_v45 = vrot.slane %v725_v38, %v3348_v35 }
 0x19f   : > { %v778_v46 = vrot.slane %v764_v41, %v3348_v35  ;;  %v779_v47 = vcombine.high %v3437_v34, %v3437_v34  ;;  %v744_v48 = vrot.slane %v730_v36, %v3348_v35  ;;  %v745_v49 = vcombine.high %v737_v42, %v737_v42 }
 0x1a0   : > { %v761_v50 = vrot.slane %v747_v44, %v3348_v35  ;;  %v762_v51 = vcombine.high %v754_v43, %v754_v43  ;;  %v788_v58 = vcombine.high %v3443_v45, %v3443_v45 }
 0x1a1   : > { %v746_v52 = vcombine.high %v744_v48, %v744_v48  ;;  %v789_v53 = vcombine.low %v737_v42, %v745_v49  ;;  %v877_v54 = vcombine.low %v745_v49, %v744_v48  ;;  %v780_v55 = vcombine.high %v778_v46, %v778_v46 }
 0x1a2   : > { %v806_v56 = vcombine.low %v754_v43, %v762_v51  ;;  %v763_v57 = vcombine.high %v761_v50, %v761_v50  ;;  %v815_v59 = vcombine.low %v779_v47, %v778_v46  ;;  %v849_v62 = vrot.slane %v761_v50, %v3348_v35 }
 0x1a3   : > { %v878_v60 = vcombine.low %v746_v52, %v754_v43  ;;  %v790_v61 = vcombine.low %v744_v48, %v746_v52  ;;  %v885_v5 = vrot.slane %v877_v54, %v3348_v35  ;;  %v831_v8 = vcombine.low %v780_v55, %v3443_v45 }
 0x1a4   : > { %v813_v6 = vrot.slane %v806_v56, %v3348_v35  ;;  %v814_v7 = vcombine.low %v763_v57, %v3437_v34  ;;  %v797_v10 = vrot.slane %v789_v53, %v3348_v35  ;;  %v829_v12 = vrot.slane %v815_v59, %v3348_v35 }
 0x1a5   : > { %v892_v9 = vrot.slane %v878_v60, %v3348_v35  ;;  %v804_v11 = vrot.slane %v790_v61, %v3348_v35  ;;  %v838_v17 = vrot.slane %v831_v8, %v3348_v35  ;;  %v857_v18 = vrot.slane %v788_v58, %v3348_v35  ;;  %v381_v61 = vld [vmem:[%s4148_s7 + $0x118] sm:$0xff] }
 0x1a6   : > { %v850_v14 = vcombine.low %v813_v6, %v849_v62  ;;  %v822_v16 = vrot.slane %v814_v7, %v3348_v35  ;;  %v903_v21 = vcombine.low %v778_v46, %v780_v55  ;;  %v902_v27 = vcombine.low %v3437_v34, %v779_v47  ;;  %v380_v62 = vld [vmem:[%s4148_s7 + $0x110] sm:$0xff]  ;;  %2853 = vmatpush3.msra.mxu0 %v381_v61 }
 0x1a7   : > { %v893_v19 = vcombine.low %v885_v5, %v892_v9  ;;  %v805_v20 = vcombine.low %v797_v10, %v804_v11  ;;  %v858_v23 = vcombine.low %v838_v17, %v857_v18  ;;  %v894_v37 = vcombine.low %v762_v51, %v761_v50  ;;  %2854 = vmatprep.subr.mxu0 %v3152_v26 }
 0x1a8   : > { %v830_v22 = vcombine.low %v822_v16, %v829_v12  ;;  %v860_v25 = vrot.slane %v850_v14, 1  ;;  %v917_v30 = vrot.slane %v903_v21, %v3348_v35  ;;  %v910_v33 = vrot.slane %v902_v27, %v3348_v35  ;;  %2855 = vmatpush3.msra.mxu0 %v380_v62 }
 0x1a9   : > { %927 = vrot.lane.b32.xlu1 %v893_v19, %s3150_s26  ;;  %v859_v24 = vrot.slane %v805_v20, 1  ;;  %v863_v29 = vrot.slane %v858_v23, 1  ;;  %v919_v39 = vcombine.low %v3443_v45, %v788_v58  ;;  %v901_v40 = vrot.slane %v894_v37, %v3348_v35  ;;  %2856 = vmatprep.subr.mxu0 %v3152_v26 }
 0x1aa   : > { %v862_v28 = vrot.slane %v830_v22, 1  ;;  %v918_v38 = vcombine.low %v910_v33, %v917_v30  ;;  %2857 = vmatpush3.msra.mxu0 %v379_v63 }
 0x1ab   : > { %v861_v32 = vsel %vm392_vm0, %v859_v24, %v860_v25  ;;  %v926_v41 = vrot.slane %v919_v39, %v3348_v35  ;;  %2858 = vmatprep.subr.mxu0 %v3152_v26 }
 0x1ac   : > { %865 = vrot.lane.b32.xlu0 %v861_v32, %s3149_s30  ;;  %v864_v31 = vsel %vm392_vm0, %v862_v28, %v863_v29 }
 0x1ad   : > { %869 = vrot.lane.b32.xlu1 %v864_v31, %s3149_s30 }
 0x1b0   : > { %867 = vrot.lane.b32.xlu0 %v860_v25, %s3149_s30 }
 0x1b1   : > { %931 = vrot.lane.b32.xlu1 %v918_v38, %s3150_s26 }
 0x1b4   : > { %929 = vrot.lane.b32.xlu0 %v901_v40, %s3150_s26 }
 0x1b5   : > { %933 = vrot.lane.b32.xlu1 %v926_v41, %s3150_s26 }
 0x1b8   : > { %871 = vrot.lane.b32.xlu0 %v863_v29, %s3149_s30 }
 0x21b   : > { %v928_v34 = vpop.permute.xlu1 %927 }
 0x21e   : > { %v866_v36 = vpop.permute.xlu0 %865 }
 0x21f   : > { %v939_v42 = vsel %vm430_vm2, %v805_v20, %v866_v36  ;;  %v870_v43 = vpop.permute.xlu1 %869 }
 0x220   : > { %v943_v44 = vsel %vm435_vm3, %v939_v42, %v928_v34  ;;  %v941_v49 = vsel %vm430_vm2, %v830_v22, %v870_v43  ;;  %v383_v43 = vld [vmem:[%s4149_s8 + $0x1] sm:$0x1] }
 0x221   : > { %v951_v45 = vcombine.high %v943_v44, %v943_v44 }
 0x222   : > { %v868_v46 = vpop.permute.xlu0 %867 }
 0x223   : > { %v953_v47 = vcombine.low %v943_v44, %v951_v45  ;;  %v932_v48 = vpop.permute.xlu1 %931  ;;  %v940_v50 = vsel %vm430_vm2, %v813_v6, %v868_v46  ;;  %v386_v46 = vld [vmem:[%s4150_s9 + $0x1] sm:$0x1] }
 0x224   : > { %v945_v52 = vsel %vm435_vm3, %v941_v49, %v932_v48 }
 0x225   : > { %2844 = vmatmul.mubr.msk.f32.vlgmr.msra.gmra.mxu1 %vm569_vm4, %v953_v47  ;;  %v952_v56 = vcombine.high %v945_v52, %v945_v52 }
 0x226   : > { %v930_v51 = vpop.permute.xlu0 %929  ;;  %2846 = vmatprep.mubr.msk.f32.mxu1 %vm3153_vm6, %v3152_v26  ;;  %2990 = vmatpush3.msra.mxu1 %v381_v61 }
 0x227   : > { %v944_v53 = vsel %vm435_vm3, %v940_v50, %v930_v51  ;;  %v934_v57 = vpop.permute.xlu1 %933  ;;  %2979 = vmatprep.subr.mxu1 %v3152_v26 }
 0x228   : > { %v954_v54 = vcombine.low %v944_v53, %v945_v52  ;;  %2991 = vmatpush3.msra.mxu1 %v380_v62 }
 0x229   : > { %2980 = vmatprep.subr.mxu1 %v3152_v26 }
 0x22a   : > { %2847 = vmatmul.mubr.msk.f32.gmra.mxu1 %vm569_vm4, %v954_v54  ;;  %v872_v55 = vpop.permute.xlu0 %871  ;;  %v378_v54 = vld [vmem:[%s4148_s7 + $0x100] sm:$0xff] }
 0x22b   : > { %v942_v58 = vsel %vm430_vm2, %v838_v17, %v872_v55  ;;  %2849 = vmatprep.mubr.msk.f32.mxu1 %vm3153_vm6, %v3152_v26  ;;  %2992 = vmatpush3.msra.mxu1 %v379_v63  ;;  %v377_v55 = vld [vmem:[%s4148_s7 + $0xf8] sm:$0xff] }
 0x22c   : > { %v946_v59 = vsel %vm435_vm3, %v942_v58, %v934_v57  ;;  %2981 = vmatprep.subr.mxu1 %v3152_v26  ;;  %2859 = vmatpush3.msra.mxu0 %v378_v54 }
 0x22d   : > { %v955_v60 = vcombine.low %v952_v56, %v946_v59  ;;  %2993 = vmatpush3.msra.mxu1 %v378_v54  ;;  %2860 = vmatprep.subr.mxu0 %v3152_v26 }
 0x22e   : > { %2982 = vmatprep.subr.mxu1 %v3152_v26  ;;  %2861 = vmatpush3.msra.mxu0 %v377_v55 }
 0x22f   : > { %2850 = vmatmul.mubr.msk.f32.gmra.mxu1 %vm569_vm4, %v955_v60  ;;  %2862 = vmatprep.subr.mxu0 %v3152_v26 }
 0x230   : > { %2879 = vmatprep.mubr.msk.f32.mxu1 %vm3153_vm6, %v3152_v26  ;;  %2994 = vmatpush3.msra.mxu1 %v377_v55 }
 0x231   : > { %2983 = vmatprep.subr.mxu1 %v3152_v26 }
 0x2e5   : > { %v1028_v4 = vpop.f32.mrf.mxu1 }
 0x2e6   : > { %v1055_v8 = vmul.f32 %v1028_v4, %v1028_v4  ;;  %v1042_v11 = vsel %vm430_vm2, %v1028_v4, 0.0 }
 0x2e7   : > { %v2845_v5 = vpop.f32.mrf.mxu1 }
 0x2e8   : > { %v1058_v16 = vsel %vm430_vm2, %v1055_v8, 0.0 }
 0x2ea   : > { %v1033_v6 = vpop.f32.mrf.mxu1 }
 0x2eb   : > { %v1056_v7 = vmul.f32 %v1033_v6, %v1033_v6  ;;  %v1043_v9 = vsel %vm430_vm2, %v1033_v6, 0.0 }
 0x2ec   : > { %v2848_v10 = vpop.f32.mrf.mxu1  ;;  %v1044_v13 = vadd.f32 %v1043_v9, %v1042_v11  ;;  %v376_v11 = vld [vmem:[%s4148_s7 + $0xf0] sm:$0xff] }
 0x2ed   : > { %v1059_v12 = vsel %vm430_vm2, %v1056_v7, 0.0  ;;  %2863 = vmatpush3.msra.mxu0 %v376_v11  ;;  %2995 = vmatpush3.msra.mxu1 %v376_v11 }
 0x2ee   : > { %v1060_v19 = vadd.f32 %v1059_v12, %v1058_v16  ;;  %2864 = vmatprep.subr.mxu0 %v3152_v26  ;;  %2984 = vmatprep.subr.mxu1 %v3152_v26 }
 0x2ef   : > { %v1038_v14 = vpop.f32.mrf.mxu1 }
 0x2f0   : > { %v1045_v17 = vsel %vm430_vm2, %v1038_v14, 0.0  ;;  %v1057_v18 = vmul.f32 %v1038_v14, %v1038_v14 }
 0x2f1   : > { %v1046_v20 = vadd.f32 %v1045_v17, %v1044_v13  ;;  %v2851_v21 = vpop.f32.mrf.mxu1  ;;  %v375_v17 = vld [vmem:[%s4148_s7 + $0xe8] sm:$0xff] }
 0x2f2   : > { %v1061_v22 = vsel %vm430_vm2, %v1057_v18, 0.0  ;;  %2865 = vmatpush3.msra.mxu0 %v375_v17  ;;  %2996 = vmatpush3.msra.mxu1 %v375_v17 }
 0x2f3   : > { %v1047_v23 = vrot.slane %v1046_v20, 4  ;;  %v1062_v24 = vadd.f32 %v1061_v22, %v1060_v19  ;;  %2866 = vmatprep.subr.mxu0 %v3152_v26  ;;  %2985 = vmatprep.subr.mxu1 %v3152_v26 }
 0x2f5   : > { %v1048_v25 = vadd.f32 %v1047_v23, %v1046_v20  ;;  %v1063_v27 = vrot.slane %v1062_v24, 4  ;;  %v374_v20 = vld [vmem:[%s4148_s7 + $0xe0] sm:$0xff]  ;;  %v373_v23 = vld [vmem:[%s4148_s7 + $0xd8] sm:$0xff] }
 0x2f6   : > { %2867 = vmatpush3.msra.mxu0 %v374_v20  ;;  %2997 = vmatpush3.msra.mxu1 %v374_v20 }
 0x2f7   : > { %v1049_v28 = vrot.slane %v1048_v25, 2  ;;  %v1064_v29 = vadd.f32 %v1063_v27, %v1062_v24  ;;  %2868 = vmatprep.subr.mxu0 %v3152_v26  ;;  %2986 = vmatprep.subr.mxu1 %v3152_v26  ;;  %v372_v24 = vld [vmem:[%s4148_s7 + $0xd0] sm:$0xff]  ;;  %v370_v27 = vld [vmem:[%s4148_s7 + $0xc0] sm:$0xff] }
 0x2f8   : > { %2869 = vmatpush3.msra.mxu0 %v373_v23  ;;  %2998 = vmatpush3.msra.mxu1 %v373_v23 }
 0x2f9   : > { %v1050_v32 = vadd.f32 %v1049_v28, %v1048_v25  ;;  %v1065_v30 = vrot.slane %v1064_v29, 2  ;;  %2870 = vmatprep.subr.mxu0 %v3152_v26  ;;  %2987 = vmatprep.subr.mxu1 %v3152_v26  ;;  %v371_v25 = vld [vmem:[%s4148_s7 + $0xc8] sm:$0xff] }
 0x2fa   : > { %2871 = vmatpush3.msra.mxu0 %v372_v24  ;;  %2999 = vmatpush3.msra.mxu1 %v372_v24 }
 0x2fb   : > { %v1051_v31 = vrot.slane %v1050_v32, 1  ;;  %v1066_v33 = vadd.f32 %v1065_v30, %v1064_v29  ;;  %2872 = vmatprep.subr.mxu0 %v3152_v26  ;;  %2988 = vmatprep.subr.mxu1 %v3152_v26 }
 0x2fc   : > { %2873 = vmatpush3.msra.mxu0 %v371_v25  ;;  %3000 = vmatpush3.msra.mxu1 %v371_v25 }
 0x2fd   : > { %v1052_v37 = vadd.f32 %v1051_v31, %v1050_v32  ;;  %v1067_v38 = vrot.slane %v1066_v33, 1  ;;  %2874 = vmatprep.subr.mxu0 %v3152_v26  ;;  %2989 = vmatprep.subr.mxu1 %v3152_v26 }
 0x2fe   : > { %2875 = vmatpush3.msra.mxu0 %v370_v27  ;;  %3001 = vmatpush3.msra.mxu1 %v370_v27 }
 0x2ff   : > { %v1054_v39 = vmul.f32 0.041666668, %v1052_v37  ;;  %v1068_v40 = vadd.f32 %v1067_v38, %v1066_v33 }
 0x301   : > { %v1069_v41 = vmul.f32 0.041666668, %v1068_v40  ;;  %v1070_v34 = vmul.f32 %v1054_v39, %v1054_v39 }
 0x303   : > { %v1071_v36 = vsub.f32 %v1069_v41, %v1070_v34 }
 0x305   : > { %v1072_v42 = vadd.f32 1e-05, %v1071_v36 }
 0x307   : > { %3077 = vrsqrt.f32 %v1072_v42 }
 0x314   : > { %v3078_v44 = vpop.eup %3077 }
 0x315   : > { %v1074_v45 = vmul.f32 %v3078_v44, %v383_v43 }
 0x317   : > { %v1075_v47 = vmul.f32 %v1074_v45, %v1054_v39  ;;  %v1080_v48 = vrot.slane %v1074_v45, %v3423_v15 }
 0x319   : > { %v1076_v49 = vsub.f32 %v386_v46, %v1075_v47  ;;  %v1081_v50 = vmul.f32 %v1080_v48, %v1028_v4  ;;  %v1082_v51 = vmul.f32 %v1080_v48, %v1033_v6  ;;  %v1083_v52 = vmul.f32 %v1080_v48, %v1038_v14 }
 0x31b   : > { %v1088_v53 = vrot.slane %v1076_v49, %v3423_v15 }
 0x31d   : > { %v1091_v56 = vadd.f32 %v1088_v53, %v1082_v51  ;;  %v1092_v57 = vadd.f32 %v1088_v53, %v1083_v52  ;;  %v1090_v58 = vadd.f32 %v1088_v53, %v1081_v50 }
 0x31f   : > { %v3551_v59 = vmax.f32 %v1091_v56, 0.0  ;;  %v1095_v60 = vmax.f32 %v1092_v57, 0.0  ;;  %v1093_v61 = vmax.f32 %v1090_v58, 0.0 }
 0x321   : > { %v1100_v62 = vcombine.high %v3551_v59, %v3551_v59  ;;  %v3557_v63 = vcombine.high %v1095_v60, %v1095_v60  ;;  %v1099_v4 = vcombine.high %v1093_v61, %v1093_v61  ;;  %v1108_v10 = vrot.slane %v3551_v59, 1 }
 0x322   : > { %v1126_v19 = vrot.slane %v3551_v59, 2 }
 0x323   : > { %v1104_v5 = vcombine.low %v1100_v62, %v1095_v60  ;;  %v1103_v6 = vcombine.low %v1093_v61, %v1099_v4  ;;  %v1111_v8 = vrot.slane %v3557_v63, 1  ;;  %v1129_v18 = vrot.slane %v3557_v63, 2 }
 0x325   : > { %v1110_v7 = vrot.slane %v1104_v5, 1  ;;  %v1107_v9 = vrot.slane %v1103_v6, 1  ;;  %v1128_v14 = vrot.slane %v1104_v5, 2  ;;  %v1125_v16 = vrot.slane %v1103_v6, 2 }
 0x327   : > { %v1112_v12 = vsel %vm392_vm0, %v1110_v7, %v1111_v8  ;;  %v1109_v13 = vsel %vm392_vm0, %v1107_v9, %v1108_v10  ;;  %v1130_v21 = vsel %vm411_vm1, %v1128_v14, %v1129_v18  ;;  %v1127_v22 = vsel %vm411_vm1, %v1125_v16, %v1126_v19 }
 0x328   : > { %1117 = vrot.lane.b32.xlu1 %v1112_v12, %s3149_s30  ;;  %1113 = vrot.lane.b32.xlu0 %v1109_v13, %s3149_s30 }
 0x32c   : > { %1135 = vrot.lane.b32.xlu1 %v1130_v21, %s3150_s26  ;;  %1131 = vrot.lane.b32.xlu0 %v1127_v22, %s3150_s26 }
 0x330   : > { %1133 = vrot.lane.b32.xlu1 %v1126_v19, %s3150_s26  ;;  %1115 = vrot.lane.b32.xlu0 %v1108_v10, %s3149_s30 }
 0x334   : > { %1137 = vrot.lane.b32.xlu1 %v1129_v18, %s3150_s26  ;;  %1119 = vrot.lane.b32.xlu0 %v1111_v8, %s3149_s30 }
 0x39a   : > { %v1118_v28 = vpop.permute.xlu1 %1117  ;;  %v1114_v29 = vpop.permute.xlu0 %1113 }
 0x39b   : > { %v1145_v32 = vsel %vm430_vm2, %v1104_v5, %v1118_v28  ;;  %v1143_v30 = vsel %vm430_vm2, %v1103_v6, %v1114_v29 }
 0x39e   : > { %v1136_v31 = vpop.permute.xlu1 %1135  ;;  %v1132_v33 = vpop.permute.xlu0 %1131 }
 0x39f   : > { %v1149_v37 = vsel %vm435_vm3, %v1145_v32, %v1136_v31  ;;  %v1147_v38 = vsel %vm435_vm3, %v1143_v30, %v1132_v33 }
 0x3a0   : > { %v1179_v39 = vcombine.high %v1149_v37, %v1149_v37  ;;  %v1186_v40 = vrot.slane %v1149_v37, %v3348_v35  ;;  %v1155_v41 = vcombine.high %v1147_v38, %v1147_v38  ;;  %v1162_v34 = vrot.slane %v1147_v38, %v3348_v35 }
 0x3a2   : > { %v1193_v36 = vrot.slane %v1179_v39, %v3348_v35  ;;  %v1194_v42 = vcombine.high %v1186_v40, %v1186_v40  ;;  %v1169_v43 = vrot.slane %v1155_v41, %v3348_v35  ;;  %v1170_v44 = vcombine.high %v1162_v34, %v1162_v34  ;;  %v1134_v45 = vpop.permute.xlu1 %1133  ;;  %v1116_v46 = vpop.permute.xlu0 %1115 }
 0x3a3   : > { %v1144_v47 = vsel %vm430_vm2, %v3551_v59, %v1116_v46 }
 0x3a4   : > { %v1171_v48 = vcombine.high %v1169_v43, %v1169_v43  ;;  %v1203_v49 = vcombine.low %v1162_v34, %v1170_v44  ;;  %v1148_v50 = vsel %vm435_vm3, %v1144_v47, %v1134_v45  ;;  %v1221_v51 = vcombine.low %v1194_v42, %v1193_v36  ;;  %v384_v47 = vld [vmem:[%s4149_s8 + $0x2] sm:$0x1] }
 0x3a5   : > { %v1178_v53 = vrot.slane %v1148_v50, %v3348_v35  ;;  %v1195_v62 = vcombine.high %v1193_v36, %v1193_v36  ;;  %v387_v50 = vld [vmem:[%s4150_s9 + $0x2] sm:$0x1] }
 0x3a6   : > { %v1204_v52 = vcombine.low %v1169_v43, %v1171_v48  ;;  %v1138_v54 = vpop.permute.xlu1 %1137  ;;  %v1120_v55 = vpop.permute.xlu0 %1119  ;;  %v1211_v57 = vrot.slane %v1203_v49, %v3348_v35  ;;  %v1235_v4 = vrot.slane %v1221_v51, %v3348_v35 }
 0x3a7   : > { %v1146_v56 = vsel %vm430_vm2, %v3557_v63, %v1120_v55  ;;  %v1220_v60 = vcombine.low %v1178_v53, %v1186_v40 }
 0x3a8   : > { %v1218_v58 = vrot.slane %v1204_v52, %v3348_v35  ;;  %v1150_v59 = vsel %vm435_vm3, %v1146_v56, %v1138_v54 }
 0x3a9   : > { %v1202_v61 = vrot.slane %v1150_v59, %v3348_v35  ;;  %v1228_v6 = vrot.slane %v1220_v60, %v3348_v35 }
 0x3aa   : > { %v1219_v5 = vcombine.low %v1211_v57, %v1218_v58 }
 0x3ab   : > { %v1236_v7 = vcombine.low %v1228_v6, %v1235_v4  ;;  %v1237_v8 = vcombine.low %v1195_v62, %v1202_v61 }
 0x3ac   : > { %2877 = vmatmul.mubr.msk.f32.vlgmr.msra.gmra.mxu0 %vm569_vm4, %v1219_v5 }
 0x3ad   : > { %2880 = vmatmul.mubr.msk.f32.vlgmr.msra.gmra.mxu1 %vm569_vm4, %v1236_v7  ;;  %v1244_v63 = vrot.slane %v1237_v8, %v3348_v35 }
 0x3ae   : > { %2882 = vmatprep.mubr.msk.f32.mxu1 %vm3153_vm6, %v3152_v26 }
 0x3b1   : > { %2883 = vmatmul.mubr.msk.f32.gmra.mxu1 %vm569_vm4, %v1244_v63 }
 0x46c   : > { %v1317_v9 = vpop.f32.mrf.mxu0 }
 0x46d   : > { %v1344_v10 = vmul.f32 %v1317_v9, %v1317_v9  ;;  %v1322_v11 = vpop.f32.mrf.mxu1  ;;  %v1331_v13 = vsel %vm430_vm2, %v1317_v9, 0.0 }
 0x46e   : > { %v2878_v12 = vpop.f32.mrf.mxu0  ;;  %v1332_v14 = vsel %vm430_vm2, %v1322_v11, 0.0  ;;  %v1345_v16 = vmul.f32 %v1322_v11, %v1322_v11 }
 0x46f   : > { %v2881_v17 = vpop.f32.mrf.mxu1  ;;  %v1347_v18 = vsel %vm430_vm2, %v1344_v10, 0.0  ;;  %v1333_v20 = vadd.f32 %v1332_v14, %v1331_v13 }
 0x470   : > { %v1348_v19 = vsel %vm430_vm2, %v1345_v16, 0.0 }
 0x471   : > { %v1327_v26 = vpop.f32.mrf.mxu1  ;;  %v1349_v23 = vadd.f32 %v1348_v19, %v1347_v18 }
 0x472   : > { %v1334_v21 = vsel %vm668_vm5, %v1327_v26, 0.0  ;;  %v1346_v22 = vmul.f32 %v1327_v26, %v1327_v26 }
 0x473   : > { %v1335_v24 = vadd.f32 %v1334_v21, %v1333_v20  ;;  %v2884_v25 = vpop.f32.mrf.mxu1 }
 0x474   : > { %v1350_v27 = vsel %vm668_vm5, %v1346_v22, 0.0 }
 0x475   : > { %v1336_v28 = vrot.slane %v1335_v24, 4  ;;  %v1351_v29 = vadd.f32 %v1350_v27, %v1349_v23 }
 0x477   : > { %v1337_v32 = vadd.f32 %v1336_v28, %v1335_v24  ;;  %v1352_v30 = vrot.slane %v1351_v29, 4 }
 0x479   : > { %v1338_v31 = vrot.slane %v1337_v32, 2  ;;  %v1353_v33 = vadd.f32 %v1352_v30, %v1351_v29 }
 0x47b   : > { %v1339_v37 = vadd.f32 %v1338_v31, %v1337_v32  ;;  %v1354_v38 = vrot.slane %v1353_v33, 2 }
 0x47d   : > { %v1340_v39 = vrot.slane %v1339_v37, 1  ;;  %v1355_v40 = vadd.f32 %v1354_v38, %v1353_v33 }
 0x47f   : > { %v1341_v41 = vadd.f32 %v1340_v39, %v1339_v37  ;;  %v1356_v34 = vrot.slane %v1355_v40, 1 }
 0x481   : > { %v1343_v36 = vmul.f32 0.05, %v1341_v41  ;;  %v1357_v42 = vadd.f32 %v1356_v34, %v1355_v40 }
 0x483   : > { %v1358_v43 = vmul.f32 0.05, %v1357_v42  ;;  %v1359_v44 = vmul.f32 %v1343_v36, %v1343_v36 }
 0x485   : > { %v1360_v45 = vsub.f32 %v1358_v43, %v1359_v44 }
 0x487   : > { %v1361_v46 = vadd.f32 1e-05, %v1360_v45 }
 0x489   : > { %3079 = vrsqrt.f32 %v1361_v46 }
 0x496   : > { %v3080_v48 = vpop.eup %3079 }
 0x497   : > { %v1363_v49 = vmul.f32 %v3080_v48, %v384_v47 }
 0x499   : > { %v1364_v51 = vmul.f32 %v1363_v49, %v1343_v36  ;;  %v1369_v52 = vrot.slane %v1363_v49, %v3423_v15 }
 0x49b   : > { %v1365_v53 = vsub.f32 %v387_v50, %v1364_v51  ;;  %v1370_v54 = vmul.f32 %v1369_v52, %v1317_v9  ;;  %v1371_v55 = vmul.f32 %v1369_v52, %v1322_v11  ;;  %v1372_v56 = vmul.f32 %v1369_v52, %v1327_v26 }
 0x49d   : > { %v1377_v57 = vrot.slane %v1365_v53, %v3423_v15 }
 0x49f   : > { %v1379_v58 = vadd.f32 %v1377_v57, %v1370_v54  ;;  %v1380_v60 = vadd.f32 %v1377_v57, %v1371_v55  ;;  %v1381_v59 = vadd.f32 %v1377_v57, %v1372_v56 }
 0x4a1   : > { %v1382_v61 = vmax.f32 %v1379_v58, 0.0  ;;  %v1383_v62 = vmax.f32 %v1380_v60, 0.0  ;;  %v1384_v4 = vmax.f32 %v1381_v59, 0.0 }
 0x4a3   : > { %v1388_v5 = vcombine.high %v1382_v61, %v1382_v61  ;;  %v1395_v6 = vrot.slane %v1382_v61, %v3348_v35  ;;  %v1405_v7 = vcombine.high %v1383_v62, %v1383_v62  ;;  %v1412_v8 = vrot.slane %v1383_v62, %v3348_v35 }
 0x4a4   : > { %v1428_v63 = vrot.slane %v1384_v4, %v3348_v35 }
 0x4a5   : > { %v1402_v9 = vrot.slane %v1388_v5, %v3348_v35  ;;  %v1403_v10 = vcombine.high %v1395_v6, %v1395_v6  ;;  %v1419_v11 = vrot.slane %v1405_v7, %v3348_v35  ;;  %v1420_v15 = vcombine.high %v1412_v8, %v1412_v8 }
 0x4a6   : > { %v1429_v12 = vcombine.high %v1428_v63, %v1428_v63  ;;  %v1453_v20 = vrot.slane %v1412_v8, %v3348_v35 }
 0x4a7   : > { %v1404_v13 = vcombine.high %v1402_v9, %v1402_v9  ;;  %v1421_v14 = vcombine.high %v1419_v11, %v1419_v11  ;;  %v1430_v16 = vcombine.low %v1395_v6, %v1403_v10  ;;  %v1454_v17 = vcombine.low %v1420_v15, %v1419_v11 }
 0x4a8   : > { %v1477_v26 = vrot.slane %v1429_v12, %v3348_v35  ;;  %v1484_v29 = vsel %vm1483_vm7, %v1453_v20, -inf }
 0x4a9   : > { %v1431_v18 = vcombine.low %v1402_v9, %v1404_v13  ;;  %v1455_v19 = vcombine.low %v1421_v14, %v1428_v63  ;;  %v1438_v21 = vrot.slane %v1430_v16, %v3348_v35  ;;  %v1462_v23 = vrot.slane %v1454_v17, %v3348_v35 }
 0x4aa   : > { %v1493_v30 = vsel %vm1483_vm7, %v1477_v26, -inf }
 0x4ab   : > { %v1445_v22 = vrot.slane %v1431_v18, %v3348_v35  ;;  %v1469_v24 = vrot.slane %v1455_v19, %v3348_v35 }
 0x4ad   : > { %v1446_v25 = vcombine.low %v1438_v21, %v1445_v22  ;;  %v1470_v27 = vcombine.low %v1462_v23, %v1469_v24 }
 0x4af   : > { %v1482_v28 = vsel %vm430_vm2, %v1446_v25, -inf  ;;  %v1492_v32 = vsel %vm430_vm2, %v1470_v27, -inf }
 0x4b0   : > { %v1485_v31 = vmax.f32 %v1482_v28, %v1484_v29  ;;  %v1494_v33 = vmax.f32 %v1492_v32, %v1493_v30 }
 0x4b2   : > { %v1486_v37 = vrot.slane %v1485_v31, 4  ;;  %v1495_v38 = vrot.slane %v1494_v33, 4 }
 0x4b4   : > { %v1487_v39 = vmax.f32 %v1485_v31, %v1486_v37  ;;  %v1496_v40 = vmax.f32 %v1494_v33, %v1495_v38 }
 0x4b6   : > { %v1488_v41 = vrot.slane %v1487_v39, 2  ;;  %v1497_v34 = vrot.slane %v1496_v40, 2 }
 0x4b8   : > { %v1489_v36 = vmax.f32 %v1487_v39, %v1488_v41  ;;  %v1498_v35 = vmax.f32 %v1496_v40, %v1497_v34 }
 0x4ba   : > { %v1490_v42 = vrot.slane %v1489_v36, 1  ;;  %v1499_v43 = vrot.slane %v1498_v35, 1 }
 0x4bc   : > { %v1491_v44 = vmax.f32 %v1489_v36, %v1490_v42  ;;  %v1500_v45 = vmax.f32 %v1498_v35, %v1499_v43 }
 0x4be   : > { %v1504_v46 = vsel %vm1503_vm8, %v1500_v45, %v1491_v44 }
 0x4bf   : > { %v1506_v47 = vsel %vm430_vm2, %v1504_v46, 0.0 }
 0x4c0   : > { %1508 = vst.msk [vmem:[%s3286_s21] sm:$0x3] %vm1507_vm9, %v1506_v47 }
 0x4c1 PF: > { %p2680_p11 = scmp.ne.s32.totalorder %s3236_s17, 1 }
 0x4c2   : > { %s3154_s20 = smov (!%p2680_p11), 32   ;;  %s3155_s28 = smov (!%p2680_p11), 64  }
 0x4c3   : > { %1512 = sbr.rel (%p2680_p11) target bundleno = 2163 (0x873), region = 68 }
 0x4c8   : > { %v1547_v48 = vrot.slane %v3272_v1, 1  ;;  %vm1545_vm10 = vcmask 1046528   ;;  %v1546_v49 = vrot.slane %v3267_v0, 1  ;;  %v1549_v50 = vrot.slane %v3277_v2, 1  ;;  %v1524_v54 = vld [vmem:[%s4145_s4 + $0x58] sm:$0xff]  ;;  %v1523_v55 = vld [vmem:[%s4145_s4 + $0x50] sm:$0xff] }
 0x4c9   : > { %v1550_v51 = vrot.slane %v3284_v3, 1  ;;  %vm1564_vm11 = vcmask 1045504   ;;  %v1565_v52 = vrot.slane %v3267_v0, 2  ;;  %v1566_v53 = vrot.slane %v3272_v1, 2  ;;  %2885 = vmatprep.subr.mxu0 %v1524_v54  ;;  %v1522_v59 = vld [vmem:[%s4145_s4 + $0x48] sm:$0xff]  ;;  %v1521_v62 = vld [vmem:[%s4145_s4 + $0x40] sm:$0xff] }
 0x4ca   : > { %1554 = vrot.lane.b32.xlu1 %v1547_v48, %s3154_s20  ;;  %v1548_v56 = vsel %vm1545_vm10, %v1546_v49, %v1547_v48  ;;  %v1568_v58 = vrot.slane %v3277_v2, 2  ;;  %v1569_v60 = vrot.slane %v3284_v3, 2  ;;  %2886 = vmatpush3.msra.mxu0 %v1524_v54  ;;  %v1520_v5 = vld [vmem:[%s4145_s4 + $0x38] sm:$0xff]  ;;  %v1519_v6 = vld [vmem:[%s4145_s4 + $0x30] sm:$0xff]  ;;  %v1518_v7 = vld [vmem:[%s4145_s4 + $0x28] sm:$0xff]  ;;  %v1601_v14 = vlaneseq }
 0x4cb   : > { %1552 = vrot.lane.b32.xlu0 %v1548_v56, %s3154_s20  ;;  %v1551_v57 = vsel %vm1545_vm10, %v1549_v50, %v1550_v51  ;;  %v1567_v61 = vsel %vm1564_vm11, %v1565_v52, %v1566_v53  ;;  %2887 = vmatprep.subr.mxu0 %v1523_v55  ;;  %v1517_v8 = vld [vmem:[%s4145_s4 + $0x20] sm:$0xff]  ;;  %v1516_v63 = vld [vmem:[%s4145_s4 + $0x18] sm:$0xff]  ;;  %v1515_v9 = vld [vmem:[%s4145_s4 + $0x10] sm:$0xff]  ;;  %v3156_v12 = vmov 1983009808   ;;  %vm1583_vm12 = vcmask 261120  }
 0x4cc   : > { %2888 = vmatpush3.msra.mxu0 %v1523_v55  ;;  %v1570_v4 = vsel %vm1564_vm11, %v1568_v58, %v1569_v60  ;;  %v1514_v10 = vld [vmem:[%s4145_s4 + $0x8] sm:$0xff]  ;;  %v1513_v11 = vld [vmem:[%s4145_s4] sm:$0xff]  ;;  %v3723_v15 = vld [vmem:[%s4142_s1 + $0x58] sm:$0xff]  ;;  %v1599_v13 = vunpack.c.l.s4 %v3156_v12  ;;  %v3726_v17 = vshrl.u32 %v1601_v14, 7  ;;  %vm1588_vm13 = vcmask 523264  }
 0x4cd   : > { %2889 = vmatprep.subr.mxu0 %v1522_v59  ;;  %vm1722_vm14 = vcmask 785408   ;;  %v3813_v12 = vld [vmem:[%s4142_s1 + $0x20] sm:$0xff]  ;;  %v3827_v14 = vld [vmem:[%s4142_s1 + $0x10] sm:$0xff]  ;;  %vm1821_vm15 = vcmask 257024   ;;  %vm3158_vm0 = vmmov 0   ;;  %vm2592_vm1 = vcmask 1041409  }
 0x4ce   : > { %1556 = vrot.lane.b32.xlu1 %v1551_v57, %s3154_s20  ;;  %2890 = vmatpush3.msra.mxu0 %v1522_v59  ;;  %v1600_v16 = vunpack.c.0.s8 %v1599_v13  ;;  %v3820_v13 = vld [vmem:[%s4142_s1 + $0x18] sm:$0xff]  ;;  %vm2572_vm2 = vcmask 259072   ;;  %vm2602_vm3 = vcmask 517120  }
 0x4cf   : > { %1571 = vrot.lane.b32.xlu0 %v1567_v61, %s3155_s28  ;;  %2891 = vmatprep.subr.mxu0 %v1521_v62 }
 0x4d0   : > { %2892 = vmatpush3.msra.mxu0 %v1521_v62  ;;  %v3729_v20 = vsub.s32 %v1600_v16, %v3726_v17  ;;  %v3834_v16 = vld [vmem:[%s4142_s1 + $0x8] sm:$0xff] }
 0x4d1   : > { %2893 = vmatprep.subr.mxu0 %v1520_v5 }
 0x4d2   : > { %1575 = vrot.lane.b32.xlu1 %v1570_v4, %s3155_s28  ;;  %2894 = vmatpush3.msra.mxu0 %v1520_v5  ;;  %v3761_v5 = vld [vmem:[%s4142_s1 + $0x50] sm:$0xff] }
 0x4d3   : > { %1573 = vrot.lane.b32.xlu0 %v1566_v53, %s3155_s28  ;;  %2895 = vmatprep.subr.mxu0 %v1519_v6 }
 0x4d4   : > { %2896 = vmatpush3.msra.mxu0 %v1519_v6 }
 0x4d5   : > { %2897 = vmatprep.subr.mxu0 %v1518_v7 }
 0x4d6   : > { %1577 = vrot.lane.b32.xlu1 %v1569_v60, %s3155_s28  ;;  %2898 = vmatpush3.msra.mxu0 %v1518_v7  ;;  %v3770_v7 = vld [vmem:[%s4142_s1 + $0x48] sm:$0xff] }
 0x4d7   : > { %1558 = vrot.lane.b32.xlu0 %v1550_v51, %s3154_s20  ;;  %2899 = vmatprep.subr.mxu0 %v1517_v8 }
 0x4d8   : > { %2900 = vmatpush3.msra.mxu0 %v1517_v8 }
 0x4d9   : > { %2901 = vmatprep.subr.mxu0 %v1516_v63 }
 0x4da   : > { %2902 = vmatpush3.msra.mxu0 %v1516_v63  ;;  %v3782_v63 = vld [vmem:[%s4142_s1 + $0x40] sm:$0xff] }
 0x4db   : > { %2903 = vmatprep.subr.mxu0 %v1515_v9 }
 0x4dc   : > { %2904 = vmatpush3.msra.mxu0 %v1515_v9  ;;  %v3792_v9 = vld [vmem:[%s4142_s1 + $0x38] sm:$0xff] }
 0x4dd   : > { %2905 = vmatprep.subr.mxu0 %v1514_v10 }
 0x4de   : > { %2906 = vmatpush3.msra.mxu0 %v1514_v10  ;;  %v3799_v10 = vld [vmem:[%s4142_s1 + $0x30] sm:$0xff] }
 0x4df   : > { %2907 = vmatprep.subr.mxu0 %v1513_v11 }
 0x4e0   : > { %2908 = vmatpush3.msra.mxu0 %v1513_v11  ;;  %v3806_v11 = vld [vmem:[%s4142_s1 + $0x28] sm:$0xff] }
 0x4e1   : > { %2948 = vmatprep.subr.mxu0 %v3723_v15 }
 0x53c   : > { %v1555_v18 = vpop.permute.xlu1 %1554 }
 0x53d   : > { %v1553_v19 = vpop.permute.xlu0 %1552  ;;  %v1585_v29 = vsel %vm1583_vm12, %v3272_v1, %v1555_v18  ;;  %v3841_v18 = vld [vmem:[%s4142_s1] sm:$0xff] }
 0x53e   : > { %v1584_v21 = vsel %vm1583_vm12, %v3267_v0, %v1553_v19  ;;  %v1536_v19 = vld [vmem:[%s4145_s4 + $0xb8] sm:$0xff] }
 0x540   : > { %v1557_v26 = vpop.permute.xlu1 %1556 }
 0x541   : > { %v1572_v22 = vpop.permute.xlu0 %1571  ;;  %v1586_v23 = vsel %vm1583_vm12, %v3277_v2, %v1557_v26  ;;  %v3157_v26 = vmov 0.0  }
 0x542   : > { %v1589_v24 = vsel %vm1588_vm13, %v1584_v21, %v1572_v22  ;;  %2915 = vmatprep.subr.mxu1 %v3157_v26  ;;  %v1535_v21 = vld [vmem:[%s4145_s4 + $0xb0] sm:$0xff]  ;;  %v1534_v22 = vld [vmem:[%s4145_s4 + $0xa8] sm:$0xff]  ;;  %2939 = vmatprep.mubr.msk.f32.mxu1 %vm3158_vm0, %v3157_v26 }
 0x543   : > { %v1597_v25 = vcombine.high %v1589_v24, %v1589_v24  ;;  %v1604_v27 = vrot.slane %v1589_v24, %v3729_v20  ;;  %2916 = vmatpush3.msra.mxu1 %v1536_v19  ;;  %v1532_v24 = vld [vmem:[%s4145_s4 + $0x98] sm:$0xff]  ;;  %v1537_v19 = vld [vmem:[%s4146_s5] sm:$0x1] }
 0x544   : > { %v1576_v28 = vpop.permute.xlu1 %1575  ;;  %2917 = vmatprep.subr.mxu1 %v3157_v26 }
 0x545   : > { %v1611_v32 = vrot.slane %v1597_v25, %v3729_v20  ;;  %v1612_v30 = vcombine.high %v1604_v27, %v1604_v27  ;;  %v1591_v31 = vsel %vm1588_vm13, %v1586_v23, %v1576_v28  ;;  %v1574_v33 = vpop.permute.xlu0 %1573  ;;  %2918 = vmatpush3.msra.mxu1 %v1535_v21  ;;  %v1533_v23 = vld [vmem:[%s4145_s4 + $0xa0] sm:$0xff]  ;;  %v1531_v25 = vld [vmem:[%s4145_s4 + $0x90] sm:$0xff]  ;;  %v3893_v21 = vsub.s32 0, %v3726_v17 }
 0x546   : > { %v1630_v0 = vcombine.high %v1591_v31, %v1591_v31  ;;  %v1637_v37 = vrot.slane %v1591_v31, %v3729_v20  ;;  %v1590_v2 = vsel %vm1588_vm13, %v1585_v29, %v1574_v33  ;;  %2919 = vmatprep.subr.mxu1 %v3157_v26  ;;  %v1529_v28 = vld [vmem:[%s4145_s4 + $0x80] sm:$0xff] }
 0x547   : > { %v1613_v38 = vcombine.high %v1611_v32, %v1611_v32  ;;  %v1663_v39 = vcombine.low %v1604_v27, %v1612_v30  ;;  %v1614_v40 = vcombine.high %v1590_v2, %v1590_v2  ;;  %v1621_v41 = vrot.slane %v1590_v2, %v3729_v20  ;;  %2920 = vmatpush3.msra.mxu1 %v1534_v22  ;;  %v1530_v27 = vld [vmem:[%s4145_s4 + $0x88] sm:$0xff] }
 0x548   : > { %v1644_v34 = vrot.slane %v1630_v0, %v3729_v20  ;;  %v1645_v36 = vcombine.high %v1637_v37, %v1637_v37  ;;  %v1578_v1 = vpop.permute.xlu1 %1577  ;;  %2921 = vmatprep.subr.mxu1 %v3157_v26 }
 0x549   : > { %v1628_v35 = vrot.slane %v1614_v40, %v3729_v20  ;;  %v1629_v42 = vcombine.high %v1621_v41, %v1621_v41  ;;  %v1559_v43 = vpop.permute.xlu0 %1558  ;;  %v1664_v44 = vcombine.low %v1611_v32, %v1613_v38  ;;  %v1671_v46 = vrot.slane %v1663_v39, %v3729_v20  ;;  %2922 = vmatpush3.msra.mxu1 %v1533_v23 }
 0x54a   : > { %v1587_v45 = vsel %vm1583_vm12, %v3284_v3, %v1559_v43  ;;  %v1697_v51 = vcombine.low %v1645_v36, %v1644_v34  ;;  %v1646_v52 = vcombine.high %v1644_v34, %v1644_v34  ;;  %2923 = vmatprep.subr.mxu1 %v3157_v26 }
 0x54b   : > { %v1680_v47 = vcombine.low %v1621_v41, %v1629_v42  ;;  %v1681_v48 = vcombine.low %v1628_v35, %v1637_v37  ;;  %v1592_v49 = vsel %vm1588_vm13, %v1587_v45, %v1578_v1  ;;  %v1678_v50 = vrot.slane %v1664_v44, %v3729_v20  ;;  %2924 = vmatpush3.msra.mxu1 %v1532_v24  ;;  %v1539_v24 = vld [vmem:[%s4147_s6] sm:$0x1] }
 0x54c   : > { %v1647_v53 = vcombine.high %v1592_v49, %v1592_v49  ;;  %v1654_v54 = vrot.slane %v1592_v49, %v3729_v20  ;;  %v1705_v61 = vrot.slane %v1697_v51, %v3729_v20  ;;  %2925 = vmatprep.subr.mxu1 %v3157_v26 }
 0x54d   : > { %v1688_v55 = vrot.slane %v1680_v47, %v3729_v20  ;;  %v1695_v56 = vrot.slane %v1681_v48, %v3729_v20  ;;  %v1679_v57 = vcombine.low %v1671_v46, %v1678_v50  ;;  %2926 = vmatpush3.msra.mxu1 %v1531_v25 }
 0x54e   : > { %v1661_v3 = vrot.slane %v1647_v53, %v3729_v20  ;;  %v1662_v58 = vcombine.high %v1654_v54, %v1654_v54  ;;  %v1698_v60 = vcombine.low %v1646_v52, %v1654_v54  ;;  %2927 = vmatprep.subr.mxu1 %v3157_v26 }
 0x54f   : > { %2909 = vmatprep.mubr.msk.f32.mxu0 %vm1722_vm14, %v1679_v57  ;;  %v1696_v59 = vcombine.low %v1688_v55, %v1695_v56  ;;  %2928 = vmatpush3.msra.mxu1 %v1530_v27 }
 0x550   : > { %v1712_v62 = vrot.slane %v1698_v60, %v3729_v20  ;;  %v1714_v4 = vcombine.low %v1662_v58, %v1661_v3  ;;  %2929 = vmatprep.subr.mxu1 %v3157_v26 }
 0x551   : > { %2910 = vmatmul.mubr.msk.f32.vlgmr.msra.gmra.mxu0 %vm1722_vm14, %v1696_v59  ;;  %2930 = vmatpush3.msra.mxu1 %v1529_v28 }
 0x552   : > { %2949 = vmatpush3.msra.mxu0 %v3723_v15  ;;  %v3765_v6 = vcombine.low %v1705_v61, %v1712_v62  ;;  %v3773_v8 = vrot.slane %v1714_v4, %v3729_v20  ;;  %2931 = vmatprep.subr.mxu1 %v3157_v26 }
 0x553   : > { %2950 = vmatprep.subr.mxu0 %v3761_v5 }
 0x554   : > { %2951 = vmatpush3.msra.mxu0 %v3761_v5  ;;  %2912 = vmatprep.mubr.msk.f32.mxu0 %vm1722_vm14, %v3765_v6 }
 0x555   : > { %2952 = vmatprep.subr.mxu0 %v3770_v7  ;;  %2913 = vmatmul.mubr.msk.f32.gmra.mxu0 %vm1722_vm14, %v3773_v8 }
 0x556   : > { %2953 = vmatpush3.msra.mxu0 %v3770_v7  ;;  %2972 = vmatprep.mubr.msk.f32.mxu0 %vm1722_vm14, %v1679_v57 }
 0x557   : > { %2954 = vmatprep.subr.mxu0 %v3782_v63 }
 0x558   : > { %2955 = vmatpush3.msra.mxu0 %v3782_v63 }
 0x559   : > { %2956 = vmatprep.subr.mxu0 %v3792_v9 }
 0x55a   : > { %2957 = vmatpush3.msra.mxu0 %v3792_v9 }
 0x55b   : > { %2958 = vmatprep.subr.mxu0 %v3799_v10 }
 0x55c   : > { %2959 = vmatpush3.msra.mxu0 %v3799_v10 }
 0x55d   : > { %2960 = vmatprep.subr.mxu0 %v3806_v11 }
 0x55e   : > { %2961 = vmatpush3.msra.mxu0 %v3806_v11 }
 0x55f   : > { %2962 = vmatprep.subr.mxu0 %v3813_v12 }
 0x560   : > { %2963 = vmatpush3.msra.mxu0 %v3813_v12 }
 0x561   : > { %2964 = vmatprep.subr.mxu0 %v3820_v13 }
 0x562   : > { %2965 = vmatpush3.msra.mxu0 %v3820_v13 }
 0x563   : > { %2966 = vmatprep.subr.mxu0 %v3827_v14 }
 0x564   : > { %2967 = vmatpush3.msra.mxu0 %v3827_v14 }
 0x565   : > { %2968 = vmatprep.subr.mxu0 %v3834_v16 }
 0x566   : > { %2969 = vmatpush3.msra.mxu0 %v3834_v16 }
 0x567   : > { %2970 = vmatprep.subr.mxu0 %v3841_v18 }
 0x568   : > { %2971 = vmatpush3.msra.mxu0 %v3841_v18 }
 0x569   : > { %2973 = vmatmul.mubr.msk.f32.vlgmr.msra.gmra.mxu0 %vm1722_vm14, %v1696_v59 }
 0x611   : > { %v2911_v29 = vpop.f32.mrf.mxu0 }
 0x612   : > { %v1833_v30 = vmul.f32 %v2911_v29, %v2911_v29  ;;  %v1817_v37 = vsel %vm1583_vm12, %v2911_v29, 0.0 }
 0x613   : > { %v1797_v32 = vpop.f32.mrf.mxu0 }
 0x614   : > { %v1816_v31 = vsel %vm1583_vm12, %v1797_v32, 0.0  ;;  %v1832_v33 = vmul.f32 %v1797_v32, %v1797_v32  ;;  %v1837_v40 = vsel %vm1583_vm12, %v1833_v30, 0.0 }
 0x615   : > { %v2914_v0 = vpop.f32.mrf.mxu0  ;;  %v1818_v38 = vadd.f32 %v1817_v37, %v1816_v31 }
 0x616   : > { %v1836_v2 = vsel %vm1583_vm12, %v1832_v33, 0.0  ;;  %v1835_v41 = vmul.f32 %v2914_v0, %v2914_v0  ;;  %v1822_v42 = vsel %vm1821_vm15, %v2914_v0, 0.0 }
 0x617   : > { %v1807_v39 = vpop.f32.mrf.mxu0  ;;  %v1838_v1 = vadd.f32 %v1837_v40, %v1836_v2 }
 0x618   : > { %v1819_v34 = vsel %vm1583_vm12, %v1807_v39, 0.0  ;;  %v1834_v36 = vmul.f32 %v1807_v39, %v1807_v39  ;;  %v1841_v46 = vsel %vm1821_vm15, %v1835_v41, 0.0 }
 0x619   : > { %v1820_v35 = vadd.f32 %v1819_v34, %v1818_v38 }
 0x61a   : > { %v1839_v43 = vsel %vm1583_vm12, %v1834_v36, 0.0 }
 0x61b   : > { %v1823_v44 = vadd.f32 %v1822_v42, %v1820_v35  ;;  %v1840_v45 = vadd.f32 %v1839_v43, %v1838_v1  ;;  %v1528_v42 = vld [vmem:[%s4145_s4 + $0x78] sm:$0xff] }
 0x61c   : > { %2932 = vmatpush3.msra.mxu1 %v1528_v42 }
 0x61d   : > { %v1824_v47 = vrot.slane %v1823_v44, 4  ;;  %v1842_v48 = vadd.f32 %v1841_v46, %v1840_v45  ;;  %2933 = vmatprep.subr.mxu1 %v3157_v26 }
 0x61f   : > { %v1825_v49 = vadd.f32 %v1824_v47, %v1823_v44  ;;  %v1843_v50 = vrot.slane %v1842_v48, 4 }
 0x621   : > { %v1826_v51 = vrot.slane %v1825_v49, 2  ;;  %v1844_v52 = vadd.f32 %v1843_v50, %v1842_v48 }
 0x623   : > { %v1827_v53 = vadd.f32 %v1826_v51, %v1825_v49  ;;  %v1845_v54 = vrot.slane %v1844_v52, 2 }
 0x625   : > { %v1828_v55 = vrot.slane %v1827_v53, 1  ;;  %v1846_v56 = vadd.f32 %v1845_v54, %v1844_v52 }
 0x627   : > { %v1829_v57 = vadd.f32 %v1828_v55, %v1827_v53  ;;  %v1847_v3 = vrot.slane %v1846_v56, 1 }
 0x629   : > { %v1831_v58 = vmul.f32 0.035714287, %v1829_v57  ;;  %v1848_v60 = vadd.f32 %v1847_v3, %v1846_v56 }
 0x62b   : > { %v1849_v59 = vmul.f32 0.035714287, %v1848_v60  ;;  %v1850_v61 = vmul.f32 %v1831_v58, %v1831_v58 }
 0x62d   : > { %v1851_v62 = vsub.f32 %v1849_v59, %v1850_v61 }
 0x62f   : > { %v1852_v4 = vadd.f32 1e-05, %v1851_v62  ;;  %v1527_v62 = vld [vmem:[%s4145_s4 + $0x70] sm:$0xff] }
 0x630   : > { %2934 = vmatpush3.msra.mxu1 %v1527_v62 }
 0x631   : > { %3081 = vrsqrt.f32 %v1852_v4  ;;  %v1526_v4 = vld [vmem:[%s4145_s4 + $0x68] sm:$0xff]  ;;  %2935 = vmatprep.subr.mxu1 %v3157_v26 }
 0x632   : > { %2936 = vmatpush3.msra.mxu1 %v1526_v4 }
 0x633   : > { %2937 = vmatprep.subr.mxu1 %v3157_v26 }
 0x63e   : > { %v3082_v22 = vpop.eup %3081 }
 0x63f   : > { %v1854_v23 = vmul.f32 %v3082_v22, %v1537_v19 }
 0x641   : > { %v1855_v25 = vmul.f32 %v1854_v23, %v1831_v58  ;;  %v1860_v27 = vrot.slane %v1854_v23, %v3893_v21 }
 0x643   : > { %v1856_v28 = vsub.f32 %v1539_v24, %v1855_v25  ;;  %v1863_v30 = vmul.f32 %v1860_v27, %v1807_v39  ;;  %v1864_v31 = vmul.f32 %v2914_v0, %v1860_v27  ;;  %v1861_v37 = vmul.f32 %v1860_v27, %v1797_v32 }
 0x644   : > { %v1862_v2 = vmul.f32 %v2911_v29, %v1860_v27 }
 0x645   : > { %v1869_v33 = vrot.slane %v1856_v28, %v3893_v21 }
 0x647   : > { %v1873_v38 = vadd.f32 %v1869_v33, %v1863_v30  ;;  %v1871_v40 = vadd.f32 %v1869_v33, %v1861_v37  ;;  %v1872_v17 = vadd.f32 %v1869_v33, %v1862_v2  ;;  %v1874_v41 = vadd.f32 %v1869_v33, %v1864_v31  ;;  %v1525_v31 = vld [vmem:[%s4145_s4 + $0x60] sm:$0xff] }
 0x648   : > { %2938 = vmatpush3.msra.mxu1 %v1525_v31 }
 0x649   : > { %v1877_v34 = vmax.f32 %v1873_v38, 0.0  ;;  %v1875_v36 = vmax.f32 %v1871_v40, 0.0  ;;  %v1876_v1 = vmax.f32 %v1872_v17, 0.0  ;;  %v1878_v35 = vmax.f32 %v1874_v41, 0.0  ;;  %3002 = vmatprep.subr.mxu1 %v3723_v15 }
 0x64b   : > { %v1917_v43 = vcombine.high %v1877_v34, %v1877_v34  ;;  %v3904_v0 = vrot.slane %v1877_v34, %v3729_v20  ;;  %v1883_v39 = vcombine.high %v1875_v36, %v1875_v36  ;;  %v1890_v29 = vrot.slane %v1875_v36, %v3729_v20 }
 0x64c   : > { %v1907_v32 = vrot.slane %v1876_v1, %v3729_v20  ;;  %v1900_v44 = vcombine.high %v1876_v1, %v1876_v1  ;;  %v3910_v45 = vrot.slane %v1878_v35, %v3729_v20 }
 0x64d   : > { %v1931_v46 = vrot.slane %v1917_v43, %v3729_v20  ;;  %v1932_v47 = vcombine.high %v3904_v0, %v3904_v0  ;;  %v1897_v48 = vrot.slane %v1883_v39, %v3729_v20  ;;  %v1898_v49 = vcombine.high %v1890_v29, %v1890_v29 }
 0x64e   : > { %v1914_v50 = vrot.slane %v1900_v44, %v3729_v20  ;;  %v1915_v51 = vcombine.high %v1907_v32, %v1907_v32  ;;  %v1941_v3 = vcombine.high %v3910_v45, %v3910_v45 }
 0x64f   : > { %v1899_v52 = vcombine.high %v1897_v48, %v1897_v48  ;;  %v1942_v53 = vcombine.low %v1890_v29, %v1898_v49  ;;  %v2030_v54 = vcombine.low %v1898_v49, %v1897_v48  ;;  %v1933_v55 = vcombine.high %v1931_v46, %v1931_v46 }
 0x650   : > { %v1959_v56 = vcombine.low %v1907_v32, %v1915_v51  ;;  %v1916_v57 = vcombine.high %v1914_v50, %v1914_v50  ;;  %v1968_v58 = vcombine.low %v1932_v47, %v1931_v46  ;;  %v2002_v61 = vrot.slane %v1914_v50, %v3729_v20 }
 0x651   : > { %v2031_v60 = vcombine.low %v1899_v52, %v1907_v32  ;;  %v1943_v59 = vcombine.low %v1897_v48, %v1899_v52  ;;  %v2038_v19 = vrot.slane %v2030_v54, %v3729_v20  ;;  %v1984_v24 = vcombine.low %v1933_v55, %v3910_v45 }
 0x652   : > { %v1966_v22 = vrot.slane %v1959_v56, %v3729_v20  ;;  %v1967_v23 = vcombine.low %v1916_v57, %v3904_v0  ;;  %v1950_v27 = vrot.slane %v1942_v53, %v3729_v20  ;;  %v1982_v30 = vrot.slane %v1968_v58, %v3729_v20 }
 0x653   : > { %v2045_v25 = vrot.slane %v2031_v60, %v3729_v20  ;;  %v1957_v28 = vrot.slane %v1943_v59, %v3729_v20  ;;  %v3940_v2 = vrot.slane %v1984_v24, %v3729_v20  ;;  %v2010_v38 = vrot.slane %v1941_v3, %v3729_v20 }
 0x654   : > { %v2003_v33 = vcombine.low %v1966_v22, %v2002_v61  ;;  %v1975_v37 = vrot.slane %v1967_v23, %v3729_v20  ;;  %v2056_v41 = vcombine.low %v1931_v46, %v1933_v55  ;;  %v2055_v42 = vcombine.low %v3904_v0, %v1932_v47 }
 0x655   : > { %v2046_v40 = vcombine.low %v2038_v19, %v2045_v25  ;;  %v1958_v17 = vcombine.low %v1950_v27, %v1957_v28  ;;  %v2011_v36 = vcombine.low %v3940_v2, %v2010_v38  ;;  %v2047_v46 = vcombine.low %v1915_v51, %v1914_v50 }
 0x656   : > { %v1983_v34 = vcombine.low %v1975_v37, %v1982_v30  ;;  %v2013_v35 = vrot.slane %v2003_v33, 1  ;;  %v2070_v32 = vrot.slane %v2056_v41, %v3729_v20  ;;  %v2063_v0 = vrot.slane %v2055_v42, %v3729_v20  ;;  %v4028_v33 = vpop.f32.mrf.mxu0 }
 0x657   : > { %2080 = vrot.lane.b32.xlu1 %v2046_v40, %s3155_s28  ;;  %v2012_v1 = vrot.slane %v1958_v17, 1  ;;  %v2016_v39 = vrot.slane %v2011_v36, 1  ;;  %v2072_v48 = vcombine.low %v3910_v45, %v1941_v3  ;;  %v2054_v49 = vrot.slane %v2047_v46, %v3729_v20 }
 0x658   : > { %v2015_v43 = vrot.slane %v1983_v34, 1  ;;  %v2071_v47 = vcombine.low %v2063_v0, %v2070_v32  ;;  %v2378_v46 = vsel %vm1583_vm12, %v4028_v33, 0.0 }
 0x659   : > { %v2014_v29 = vsel %vm1545_vm10, %v2012_v1, %v2013_v35  ;;  %v2079_v52 = vrot.slane %v2072_v48, %v3729_v20 }
 0x65a   : > { %2018 = vrot.lane.b32.xlu0 %v2014_v29, %s3154_s20  ;;  %v2017_v44 = vsel %vm1545_vm10, %v2015_v43, %v2016_v39 }
 0x65b   : > { %2022 = vrot.lane.b32.xlu1 %v2017_v44, %s3154_s20 }
 0x65e   : > { %2020 = vrot.lane.b32.xlu0 %v2013_v35, %s3154_s20 }
 0x65f   : > { %2084 = vrot.lane.b32.xlu1 %v2071_v47, %s3155_s28 }
 0x662   : > { %2082 = vrot.lane.b32.xlu0 %v2054_v49, %s3155_s28 }
 0x663   : > { %2086 = vrot.lane.b32.xlu1 %v2079_v52, %s3155_s28 }
 0x666   : > { %2024 = vrot.lane.b32.xlu0 %v2016_v39, %s3154_s20  ;;  %v2392_v39 = vmul.f32 %v4028_v33, %v4028_v33 }
 0x6c9   : > { %v2081_v53 = vpop.permute.xlu1 %2080 }
 0x6cc   : > { %v2019_v54 = vpop.permute.xlu0 %2018 }
 0x6cd   : > { %v2092_v50 = vsel %vm1583_vm12, %v1958_v17, %v2019_v54  ;;  %v2023_v51 = vpop.permute.xlu1 %2022  ;;  %v4030_v17 = vpop.f32.mrf.mxu0  ;;  %v2396_v54 = vsel %vm1583_vm12, %v2392_v39, 0.0 }
 0x6ce   : > { %v2096_v45 = vsel %vm1588_vm13, %v2092_v50, %v2081_v53  ;;  %v2094_v58 = vsel %vm1583_vm12, %v1983_v34, %v2023_v51  ;;  %v2391_v35 = vmul.f32 %v4030_v17, %v4030_v17  ;;  %v2377_v29 = vsel %vm1583_vm12, %v4030_v17, 0.0 }
 0x6cf   : > { %v2104_v55 = vcombine.high %v2096_v45, %v2096_v45  ;;  %v2379_v48 = vadd.f32 %v2378_v46, %v2377_v29 }
 0x6d0   : > { %v2021_v56 = vpop.permute.xlu0 %2020  ;;  %v2395_v47 = vsel %vm1583_vm12, %v2391_v35, 0.0 }
 0x6d1   : > { %v2106_v57 = vcombine.low %v2096_v45, %v2104_v55  ;;  %v2085_v3 = vpop.permute.xlu1 %2084  ;;  %v2093_v60 = vsel %vm1583_vm12, %v1966_v22, %v2021_v56  ;;  %v2397_v55 = vadd.f32 %v2396_v54, %v2395_v47  ;;  %v2290_v54 = vld [vmem:[%s4143_s2] sm:$0x1] }
 0x6d2   : > { %v2098_v61 = vsel %vm1588_vm13, %v2094_v58, %v2085_v3 }
 0x6d3   : > { %2940 = vmatmul.mubr.msk.f32.vlgmr.msra.gmra.mxu1 %vm1722_vm14, %v2106_v57  ;;  %v2105_v22 = vcombine.high %v2098_v61, %v2098_v61 }
 0x6d4   : > { %3014 = vmatpush3.msra.mxu1 %v3723_v15  ;;  %v2083_v59 = vpop.permute.xlu0 %2082  ;;  %2942 = vmatprep.mubr.msk.f32.mxu1 %vm3158_vm0, %v3157_v26 }
 0x6d5   : > { %3003 = vmatprep.subr.mxu1 %v3761_v5  ;;  %v2097_v62 = vsel %vm1588_vm13, %v2093_v60, %v2083_v59  ;;  %v2087_v15 = vpop.permute.xlu1 %2086 }
 0x6d6   : > { %v2107_v4 = vcombine.low %v2097_v62, %v2098_v61  ;;  %3015 = vmatpush3.msra.mxu1 %v3761_v5 }
 0x6d7   : > { %3004 = vmatprep.subr.mxu1 %v3770_v7 }
 0x6d8   : > { %3016 = vmatpush3.msra.mxu1 %v3770_v7  ;;  %v2025_v19 = vpop.permute.xlu0 %2024 }
 0x6d9   : > { %2943 = vmatmul.mubr.msk.f32.gmra.mxu1 %vm1722_vm14, %v2107_v4  ;;  %3005 = vmatprep.subr.mxu1 %v3782_v63  ;;  %v2095_v23 = vsel %vm1583_vm12, %v3940_v2, %v2025_v19 }
 0x6da   : > { %v2099_v24 = vsel %vm1588_vm13, %v2095_v23, %v2087_v15  ;;  %3017 = vmatpush3.msra.mxu1 %v3782_v63  ;;  %2945 = vmatprep.mubr.msk.f32.mxu1 %vm3158_vm0, %v3157_v26 }
 0x6db   : > { %v2108_v5 = vcombine.low %v2105_v22, %v2099_v24  ;;  %3006 = vmatprep.subr.mxu1 %v3792_v9 }
 0x6dc   : > { %3018 = vmatpush3.msra.mxu1 %v3792_v9 }
 0x6dd   : > { %3007 = vmatprep.subr.mxu1 %v3799_v10  ;;  %2946 = vmatmul.mubr.msk.f32.gmra.mxu1 %vm1722_vm14, %v2108_v5 }
 0x6de   : > { %3019 = vmatpush3.msra.mxu1 %v3799_v10  ;;  %2975 = vmatprep.mubr.msk.f32.mxu1 %vm1722_vm14, %v3765_v6 }
 0x6df   : > { %3008 = vmatprep.subr.mxu1 %v3806_v11 }
 0x6e0   : > { %3020 = vmatpush3.msra.mxu1 %v3806_v11 }
 0x6e1   : > { %3009 = vmatprep.subr.mxu1 %v3813_v12 }
 0x6e2   : > { %3021 = vmatpush3.msra.mxu1 %v3813_v12 }
 0x6e3   : > { %3010 = vmatprep.subr.mxu1 %v3820_v13 }
 0x6e4   : > { %3022 = vmatpush3.msra.mxu1 %v3820_v13 }
 0x6e5   : > { %3011 = vmatprep.subr.mxu1 %v3827_v14 }
 0x6e6   : > { %3023 = vmatpush3.msra.mxu1 %v3827_v14 }
 0x6e7   : > { %3012 = vmatprep.subr.mxu1 %v3834_v16 }
 0x6e8   : > { %3024 = vmatpush3.msra.mxu1 %v3834_v16 }
 0x6e9   : > { %3013 = vmatprep.subr.mxu1 %v3841_v18 }
 0x6ea   : > { %3025 = vmatpush3.msra.mxu1 %v3841_v18 }
 0x6eb   : > { %2976 = vmatmul.mubr.msk.f32.vlgmr.msra.gmra.mxu1 %vm1722_vm14, %v3773_v8 }
 0x793   : > { %v4007_v6 = vpop.f32.mrf.mxu1 }
 0x794   : > { %v2208_v63 = vmul.f32 %v4007_v6, %v4007_v6  ;;  %v2195_v10 = vsel %vm1583_vm12, %v4007_v6, 0.0 }
 0x795   : > { %v2941_v7 = vpop.f32.mrf.mxu1 }
 0x796   : > { %v2211_v8 = vsel %vm1583_vm12, %v2208_v63, 0.0 }
 0x799   : > { %v4011_v9 = vpop.f32.mrf.mxu1 }
 0x79a   : > { %v2196_v11 = vsel %vm1583_vm12, %v4011_v9, 0.0  ;;  %v2209_v12 = vmul.f32 %v4011_v9, %v4011_v9 }
 0x79b   : > { %v2197_v13 = vadd.f32 %v2196_v11, %v2195_v10  ;;  %v2944_v14 = vpop.f32.mrf.mxu1 }
 0x79c   : > { %v2212_v16 = vsel %vm1583_vm12, %v2209_v12, 0.0 }
 0x79d   : > { %v2213_v18 = vadd.f32 %v2212_v16, %v2211_v8  ;;  %v4021_v26 = vpop.f32.mrf.mxu1 }
 0x79e   : > { %v2198_v25 = vsel %vm1583_vm12, %v4021_v26, 0.0  ;;  %v2210_v27 = vmul.f32 %v4021_v26, %v4021_v26 }
 0x79f   : > { %v2199_v28 = vadd.f32 %v2198_v25, %v2197_v13  ;;  %v2947_v30 = vpop.f32.mrf.mxu1 }
 0x7a0   : > { %v2214_v31 = vsel %vm1583_vm12, %v2210_v27, 0.0 }
 0x7a1   : > { %v2200_v37 = vrot.slane %v2199_v28, 4  ;;  %v2215_v2 = vadd.f32 %v2214_v31, %v2213_v18  ;;  %v1538_v18 = vld [vmem:[%s4146_s5 + $0x1] sm:$0x1] }
 0x7a3   : > { %v2201_v38 = vadd.f32 %v2200_v37, %v2199_v28  ;;  %v2216_v40 = vrot.slane %v2215_v2, 4  ;;  %v1540_v37 = vld [vmem:[%s4147_s6 + $0x1] sm:$0x1] }
 0x7a5   : > { %v2202_v41 = vrot.slane %v2201_v38, 2  ;;  %v2217_v34 = vadd.f32 %v2216_v40, %v2215_v2 }
 0x7a7   : > { %v2203_v36 = vadd.f32 %v2202_v41, %v2201_v38  ;;  %v2218_v1 = vrot.slane %v2217_v34, 2 }
 0x7a9   : > { %v2204_v42 = vrot.slane %v2203_v36, 1  ;;  %v2219_v43 = vadd.f32 %v2218_v1, %v2217_v34 }
 0x7ab   : > { %v2205_v32 = vadd.f32 %v2204_v42, %v2203_v36  ;;  %v2220_v44 = vrot.slane %v2219_v43, 1  ;;  %v4038_v0 = vpop.f32.mrf.mxu1 }
 0x7ac   : > { %v2394_v50 = vmul.f32 %v4038_v0, %v4038_v0  ;;  %v2382_v58 = vsel %vm1821_vm15, %v4038_v0, 0.0 }
 0x7ad   : > { %v2207_v49 = vmul.f32 0.041666668, %v2205_v32  ;;  %v2221_v52 = vadd.f32 %v2220_v44, %v2219_v43  ;;  %v4043_v53 = vpop.f32.mrf.mxu1 }
 0x7ae   : > { %v2380_v51 = vsel %vm1583_vm12, %v4043_v53, 0.0  ;;  %v2393_v45 = vmul.f32 %v4043_v53, %v4043_v53  ;;  %v2400_v4 = vsel %vm1821_vm15, %v2394_v50, 0.0 }
 0x7af   : > { %v2222_v56 = vmul.f32 0.041666668, %v2221_v52  ;;  %v2223_v57 = vmul.f32 %v2207_v49, %v2207_v49  ;;  %v2381_v3 = vadd.f32 %v2380_v51, %v2379_v48 }
 0x7b0   : > { %v2398_v60 = vsel %vm1583_vm12, %v2393_v45, 0.0 }
 0x7b1   : > { %v2224_v59 = vsub.f32 %v2222_v56, %v2223_v57  ;;  %v2383_v61 = vadd.f32 %v2382_v58, %v2381_v3  ;;  %v2399_v62 = vadd.f32 %v2398_v60, %v2397_v55  ;;  %v2291_v58 = vld [vmem:[%s4144_s3] sm:$0x1] }
 0x7b3   : > { %v2225_v19 = vadd.f32 1e-05, %v2224_v59  ;;  %v2384_v22 = vrot.slane %v2383_v61, 4  ;;  %v2401_v15 = vadd.f32 %v2400_v4, %v2399_v62 }
 0x7b5   : > { %3083 = vrsqrt.f32 %v2225_v19  ;;  %v2385_v23 = vadd.f32 %v2384_v22, %v2383_v61  ;;  %v2402_v24 = vrot.slane %v2401_v15, 4 }
 0x7b7   : > { %v2386_v5 = vrot.slane %v2385_v23, 2  ;;  %v2403_v7 = vadd.f32 %v2402_v24, %v2401_v15 }
 0x7b9   : > { %v2387_v63 = vadd.f32 %v2386_v5, %v2385_v23  ;;  %v2404_v10 = vrot.slane %v2403_v7, 2 }
 0x7bb   : > { %v2388_v11 = vrot.slane %v2387_v63, 1  ;;  %v2405_v12 = vadd.f32 %v2404_v10, %v2403_v7 }
 0x7bd   : > { %v2389_v13 = vadd.f32 %v2388_v11, %v2387_v63  ;;  %v2406_v14 = vrot.slane %v2405_v12, 1 }
 0x7bf   : > { %v2390_v8 = vmul.f32 0.035714287, %v2389_v13  ;;  %v2407_v16 = vadd.f32 %v2406_v14, %v2405_v12 }
 0x7c1   : > { %v2408_v25 = vmul.f32 0.035714287, %v2407_v16  ;;  %v2409_v27 = vmul.f32 %v2390_v8, %v2390_v8 }
 0x7c2   : > { %v3084_v28 = vpop.eup %3083 }
 0x7c3   : > { %v2227_v30 = vmul.f32 %v3084_v28, %v1538_v18  ;;  %v2410_v31 = vsub.f32 %v2408_v25, %v2409_v27 }
 0x7c5   : > { %v2228_v2 = vmul.f32 %v2227_v30, %v2207_v49  ;;  %v2233_v38 = vrot.slane %v2227_v30, %v3893_v21  ;;  %v2411_v40 = vadd.f32 1e-05, %v2410_v31 }
 0x7c7   : > { %v2229_v41 = vsub.f32 %v1540_v37, %v2228_v2  ;;  %v2234_v34 = vmul.f32 %v2233_v38, %v4007_v6  ;;  %v2235_v36 = vmul.f32 %v2233_v38, %v4011_v9  ;;  %v2236_v1 = vmul.f32 %v2233_v38, %v4021_v26 }
 0x7c8   : > { %3085 = vrsqrt.f32 %v2411_v40 }
 0x7c9   : > { %v2241_v35 = vrot.slane %v2229_v41, %v3893_v21 }
 0x7cb   : > { %v2243_v42 = vadd.f32 %v2241_v35, %v2234_v34  ;;  %v2244_v43 = vadd.f32 %v2241_v35, %v2235_v36  ;;  %v2245_v39 = vadd.f32 %v2241_v35, %v2236_v1 }
 0x7cd   : > { %v2246_v29 = vmax.f32 %v2243_v42, 0.0  ;;  %v2247_v32 = vmax.f32 %v2244_v43, 0.0  ;;  %v2248_v44 = vmax.f32 %v2245_v39, 0.0 }
 0x7cf   : > { %v2252_v46 = vcombine.high %v2246_v29, %v2246_v29  ;;  %v2253_v47 = vcombine.high %v2247_v32, %v2247_v32  ;;  %v2254_v48 = vcombine.high %v2248_v44, %v2248_v44  ;;  %v2261_v6 = vsel %vm1821_vm15, %v2247_v32, -inf }
 0x7d1   : > { %v2256_v49 = vcombine.low %v2246_v29, %v2252_v46  ;;  %v2257_v52 = vcombine.low %v2253_v47, %v2248_v44  ;;  %v2270_v26 = vsel %vm1821_vm15, %v2254_v48, -inf }
 0x7d3   : > { %v2269_v9 = vsel %vm1583_vm12, %v2257_v52, -inf  ;;  %v2260_v50 = vsel %vm1583_vm12, %v2256_v49, -inf }
 0x7d4   : > { %v2271_v51 = vmax.f32 %v2269_v9, %v2270_v26  ;;  %v2262_v45 = vmax.f32 %v2260_v50, %v2261_v6 }
 0x7d5   : > { %v3086_v55 = vpop.eup %3085 }
 0x7d6   : > { %v2272_v56 = vrot.slane %v2271_v51, 4  ;;  %v2413_v57 = vmul.f32 %v3086_v55, %v2290_v54  ;;  %v2263_v3 = vrot.slane %v2262_v45, 4 }
 0x7d8   : > { %v2414_v60 = vmul.f32 %v2413_v57, %v2390_v8  ;;  %v2419_v59 = vrot.slane %v2413_v57, %v3893_v21  ;;  %v2264_v61 = vmax.f32 %v2262_v45, %v2263_v3  ;;  %v2273_v62 = vmax.f32 %v2271_v51, %v2272_v56 }
 0x7da   : > { %v2415_v4 = vsub.f32 %v2291_v58, %v2414_v60  ;;  %v2420_v19 = vmul.f32 %v2419_v59, %v4030_v17  ;;  %v2265_v22 = vrot.slane %v2264_v61, 2  ;;  %v2274_v15 = vrot.slane %v2273_v62, 2 }
 0x7db   : > { %v2421_v23 = vmul.f32 %v4028_v33, %v2419_v59  ;;  %v2422_v24 = vmul.f32 %v2419_v59, %v4043_v53  ;;  %v2423_v5 = vmul.f32 %v4038_v0, %v2419_v59 }
 0x7dc   : > { %v2428_v7 = vrot.slane %v2415_v4, %v3893_v21  ;;  %v2266_v63 = vmax.f32 %v2264_v61, %v2265_v22  ;;  %v2275_v10 = vmax.f32 %v2273_v62, %v2274_v15 }
 0x7de   : > { %v2430_v11 = vadd.f32 %v2428_v7, %v2420_v19  ;;  %v2431_v12 = vadd.f32 %v2428_v7, %v2421_v23  ;;  %v2432_v13 = vadd.f32 %v2428_v7, %v2422_v24  ;;  %v2433_v14 = vadd.f32 %v2428_v7, %v2423_v5 }
 0x7df   : > { %v2267_v8 = vrot.slane %v2266_v63, 1  ;;  %v2276_v16 = vrot.slane %v2275_v10, 1 }
 0x7e0   : > { %v2434_v17 = vmax.f32 %v2430_v11, 0.0  ;;  %v2435_v18 = vmax.f32 %v2431_v12, 0.0  ;;  %v2436_v25 = vmax.f32 %v2432_v13, 0.0  ;;  %v2437_v27 = vmax.f32 %v2433_v14, 0.0 }
 0x7e1   : > { %v2268_v33 = vmax.f32 %v2266_v63, %v2267_v8  ;;  %v2277_v28 = vmax.f32 %v2275_v10, %v2276_v16 }
 0x7e2   : > { %v2442_v53 = vcombine.high %v2434_v17, %v2434_v17  ;;  %v2459_v30 = vcombine.high %v2435_v18, %v2435_v18  ;;  %v2466_v0 = vrot.slane %v2435_v18, %v3729_v20  ;;  %v2476_v21 = vcombine.high %v2436_v25, %v2436_v25 }
 0x7e3   : > { %v2483_v31 = vrot.slane %v2436_v25, %v3729_v20  ;;  %v2499_v37 = vrot.slane %v2437_v27, %v3729_v20  ;;  %v2449_v2 = vrot.slane %v2434_v17, %v3729_v20  ;;  %v2593_v38 = vsel %vm2592_vm1, %v2277_v28, %v2268_v33 }
 0x7e4   : > { %v2473_v40 = vrot.slane %v2459_v30, %v3729_v20  ;;  %v2474_v41 = vcombine.high %v2466_v0, %v2466_v0  ;;  %v2490_v34 = vrot.slane %v2476_v21, %v3729_v20  ;;  %v2456_v36 = vrot.slane %v2442_v53, %v3729_v20 }
 0x7e5   : > { %v2491_v1 = vcombine.high %v2483_v31, %v2483_v31  ;;  %v2500_v35 = vcombine.high %v2499_v37, %v2499_v37  ;;  %v2457_v42 = vcombine.high %v2449_v2, %v2449_v2 }
 0x7e6   : > { %v2475_v43 = vcombine.high %v2473_v40, %v2473_v40  ;;  %v2492_v39 = vcombine.high %v2490_v34, %v2490_v34  ;;  %v2458_v29 = vcombine.high %v2456_v36, %v2456_v36  ;;  %v2518_v46 = vcombine.low %v2466_v0, %v2474_v41 }
 0x7e7   : > { %v2535_v32 = vcombine.low %v2491_v1, %v2490_v34  ;;  %v2501_v44 = vcombine.low %v2449_v2, %v2457_v42  ;;  %v2532_v52 = vrot.slane %v2473_v40, %v3729_v20  ;;  %v2565_v26 = vrot.slane %v2500_v35, %v3729_v20 }
 0x7e8   : > { %v2534_v47 = vcombine.low %v2475_v43, %v2483_v31  ;;  %v2551_v48 = vcombine.low %v2492_v39, %v2499_v37  ;;  %v2502_v49 = vcombine.low %v2456_v36, %v2458_v29  ;;  %v2525_v9 = vrot.slane %v2518_v46, %v3729_v20 }
 0x7e9   : > { %v2549_v6 = vrot.slane %v2535_v32, %v3729_v20  ;;  %v2509_v51 = vrot.slane %v2501_v44, %v3729_v20 }
 0x7ea   : > { %v2542_v54 = vrot.slane %v2534_v47, %v3729_v20  ;;  %v2558_v50 = vrot.slane %v2551_v48, %v3729_v20  ;;  %v2516_v45 = vrot.slane %v2502_v49, %v3729_v20  ;;  %v2533_v55 = vcombine.low %v2525_v9, %v2532_v52 }
 0x7ec   : > { %v2550_v56 = vcombine.low %v2542_v54, %v2549_v6  ;;  %v2517_v57 = vcombine.low %v2509_v51, %v2516_v45  ;;  %v2566_v3 = vcombine.low %v2558_v50, %v2565_v26  ;;  %v2573_v60 = vsel %vm2572_vm2, %v2533_v55, -inf }
 0x7ee   : > { %v2571_v58 = vsel %vm1583_vm12, %v2517_v57, -inf  ;;  %v2581_v59 = vsel %vm1583_vm12, %v2550_v56, -inf  ;;  %v2582_v61 = vsel %vm2572_vm2, %v2566_v3, -inf }
 0x7ef   : > { %v2574_v62 = vmax.f32 %v2571_v58, %v2573_v60  ;;  %v2583_v4 = vmax.f32 %v2581_v59, %v2582_v61 }
 0x7f1   : > { %v2575_v19 = vrot.slane %v2574_v62, 4  ;;  %v2584_v22 = vrot.slane %v2583_v4, 4 }
 0x7f3   : > { %v2576_v15 = vmax.f32 %v2574_v62, %v2575_v19  ;;  %v2585_v23 = vmax.f32 %v2583_v4, %v2584_v22 }
 0x7f5   : > { %v2577_v24 = vrot.slane %v2576_v15, 2  ;;  %v2586_v20 = vrot.slane %v2585_v23, 2 }
 0x7f7   : > { %v2578_v5 = vmax.f32 %v2576_v15, %v2577_v24  ;;  %v2587_v7 = vmax.f32 %v2585_v23, %v2586_v20 }
 0x7f9   : > { %v2579_v63 = vrot.slane %v2578_v5, 1  ;;  %v2588_v10 = vrot.slane %v2587_v7, 1 }
 0x7fb   : > { %v2580_v11 = vmax.f32 %v2578_v5, %v2579_v63  ;;  %v2589_v12 = vmax.f32 %v2587_v7, %v2588_v10 }
 0x7fd   : > { %v2597_v13 = vsel %vm2592_vm1, %v2589_v12, %v2580_v11 }
 0x7fe   : > { %2598 = vrot.lane.b32.xlu0 %v2597_v13, %s3154_s20 }
 0x870   : > { %v2599_v14 = vpop.permute.xlu0 %2598 }
 0x871   : > { %v2601_v8 = vsel %vm1583_vm12, %v2593_v38, %v2599_v14 }
 0x872   : > { %2603 = vst.msk [vmem:[%s3286_s21] sm:$0x3] %vm2602_vm3, %v2601_v8 }
 0x873 PF: > { %s2693_s18 = sshll.u32 %s3236_s17, 5  ;;  %s2618_s26 = sshll.u32 %s3286_s21, 4  ;;  %s2619_s26 = int_to_ptr.vmem [resolvable:$true] %s2618_s26 }
 0x874   : > { %s2616_s30 = scalar_lea.hbm %s4151_s10, %s2693_s18  ;;  %s4157_s25 = sand.u32 1, %s3139_s14  }
 0x875   : > { %s2605_s29 = scalar_lea.sflag [#allocation3], %s4157_s25  ;;  %s3087_s20 = scalar_lea.vmem %s2619_s26, 32 }
 0x876   : > { %p3088_p12 = scmp.ne.s32.totalorder %s2619_s26, %s3087_s20  ;;  %s3159_s11 = smov [#allocation2]  }
 0x877   : > { %s3091_s12 = sshll.u32 %s3159_s11, 4  ;;  %s3092_s12 = int_to_ptr.vmem [resolvable:$false] %s3091_s12 }
 0x878   : > { %p3089_p13 = pnand %p3088_p12, %p3253_p5  ;;  %s3093_s0 = scalar_lea.vmem %s3092_s12, 64 }
 0x879   : > { %p3094_p1 = scmp.lt.s32.totalorder %s2619_s26, %s3092_s12  ;;  %p3095_p2 = scmp.lt.s32.totalorder %s3093_s0, %s3087_s20 }
 0x87a   : > { %p3090_p0 = pneg %p3089_p13 }
 0x87b   : > { %p3096_p3 = por %p3095_p2, %p3094_p1 }
 0x87d   : > { %p3097_p4 = pnand %p3096_p3, %p3090_p0 }
 0x87f   : > { %3100 = shalt.err (!%p3097_p4)
}
 0x880   : > { %s3101_s17 = scalar_lea.hbm %s2616_s30, 32  ;;  %s3105_s28 = scalar_lea.hbm %s4151_s10, 64 }
 0x881   : > { %p3102_p7 = scmp.ne.s32.totalorder %s2616_s30, %s3101_s17  ;;  %p3106_p10 = scmp.lt.s32.totalorder %s2616_s30, %s4151_s10 }
 0x882   : > { %p3107_p11 = scmp.lt.s32.totalorder %s3105_s28, %s3101_s17 }
 0x883   : > { %p3103_p8 = pnand %p3102_p7, %p3253_p5 }
 0x884   : > { %p3108_p12 = por %p3107_p11, %p3106_p10 }
 0x885   : > { %p3104_p9 = pneg %p3103_p8 }
 0x887   : > { %p3109_p13 = pnand %p3108_p12, %p3104_p9 }
 0x889   : > { %3112 = shalt.err (!%p3109_p13)
}
 0x88a   : > { %3026 = dma.vmem_to_hbm [thread:$0]  (%p3253_p5), %s2619_s26, 32, %s2616_s30, %s2605_s29  }
 0x88b PF: > { %p3032_p0 = scmp.ge.s32.totalorder %s3147_s16, 2  ;;  %s2630_s0 = sand.u32 1, %s3135_s13  }
 0x88c   : > { %s2631_s20 = scalar_lea.sflag [#allocation3], %s2630_s0 }
 0x88d   : > { %p3029_p1 = pnand %p3032_p0, %p3257_p6 }
 0x88f   : > { %p3030_p2 = pneg %p3029_p1 }
 0x891   : > { %3130 = dma.done.wait (%p3030_p2), %s2631_s20, 32  }
 0x892   : > { %3132 = vsyncadd (%p3030_p2), %s2631_s20, 4294967264  ;;  %p20_p3 = scmp.ge.s32.totalorder %s3240_s19, 4   ;;  %s4158_s13 = smov %s3139_s14 }
 0x893   : > { %s4159_s14 = smov %s3143_s15  ;;  %s4160_s15 = smov %s3251_s22 }
 0x894   : > { %s4161_s16 = smov %s3240_s19  ;;  %22 = sbr.rel (!%p20_p3) target bundleno = 5 (0x5), region = 100 }
 0x899   :  { %2636 = vsyncpa [#allocation3], 1 }
 0x89a   :  { %2638 = vsyncpa [#allocation3 + $0x1], 1 }

</bundles_post_ra>
